<compile_context>
chip_gen: v7x
topology: tpu7x:2x2x1
jax: 0.10.0
libtpu: 0.0.40
codegen_flags: <defaults>
</compile_context>

<pallas_src>
import jax
import jax.numpy as jnp
import numpy as np
from jax.experimental import pallas as pl
from jax.experimental.pallas import tpu as pltpu


def decoder_kernel(features_ref, emb_ref, len_ref,
                   w_cell_ref, b_cell_ref,
                   w_ih_ref, w_hh_ref, b_lstm_ref,
                   w_out_ref, b_out_ref,
                   out_ref):
    Hp = w_hh_ref.shape[0]            # padded hidden size (multiple of 128)
    Bp = features_ref.shape[0]        # padded batch (multiple of 8)
    T = emb_ref.shape[0] // Bp        # static number of time steps (L - 1)

    # ---- hoist every weight / bias / length read out of the loop ----
    w_hh = w_hh_ref[...]              # (Hp, 4Hp)
    w_out = w_out_ref[...]            # (Hp, Vp)
    b_out = b_out_ref[...]            # (1, Vp)
    lengths = len_ref[...]            # (Bp, 1) int32

    # ---- normalize(features): rsqrt on the EUP, eps clamp like F.normalize ----
    feats = features_ref[...]                                          # (Bp, F)
    sumsq = jnp.sum(feats * feats, axis=-1, keepdims=True)
    feats = feats * jax.lax.rsqrt(jnp.maximum(sumsq, 1e-24))
    # dropout(p=0.2): identity at inference

    # ---- LSTMCell(features) with zero initial (h, c) ----
    gates0 = jnp.dot(feats, w_cell_ref[...],
                     preferred_element_type=jnp.float32) + b_cell_ref[...]   # (Bp, 4Hp)
    i0 = jax.nn.sigmoid(gates0[:, 0 * Hp:1 * Hp])
    # f-gate * c_prev == 0 since c_prev == 0
    g0 = jnp.tanh(gates0[:, 2 * Hp:3 * Hp])
    o0 = jax.nn.sigmoid(gates0[:, 3 * Hp:4 * Hp])
    c = i0 * g0
    h = o0 * jnp.tanh(c)

    # ---- hoisted input projection: ONE matmul for all time steps ----
    pre = jnp.dot(emb_ref[...], w_ih_ref[...],
                  preferred_element_type=jnp.float32) + b_lstm_ref[...]      # (T*Bp, 4Hp)

    # ---- recurrence: fully unrolled, body = h @ W_hh + elementwise only ----
    hs = []
    for t in range(T):                      # T is small and static -> unroll
        gates = pre[t * Bp:(t + 1) * Bp, :] + jnp.dot(
            h, w_hh, preferred_element_type=jnp.float32)                     # (Bp, 4Hp)
        i_g = jax.nn.sigmoid(gates[:, 0 * Hp:1 * Hp])
        f_g = jax.nn.sigmoid(gates[:, 1 * Hp:2 * Hp])
        g_g = jnp.tanh(gates[:, 2 * Hp:3 * Hp])
        o_g = jax.nn.sigmoid(gates[:, 3 * Hp:4 * Hp])
        c = f_g * c + i_g * g_g
        h = o_g * jnp.tanh(c)
        # pack_padded_sequence: hidden states beyond lengths[b] contribute zeros
        hs.append(h * (lengths > t).astype(jnp.float32))

    # ---- deferred output projection: one GEMM + one lane-dense store ----
    hs_all = jnp.concatenate(hs, axis=0)                                     # (T*Bp, Hp)
    out_ref[...] = jnp.dot(hs_all, w_out,
                           preferred_element_type=jnp.float32) + b_out       # (T*Bp, Vp)


def _round_up(x, m):
    return ((x + m - 1) // m) * m


def _full_spec(shape):
    zeros = (0,) * len(shape)
    return pl.BlockSpec(shape, lambda i, z=zeros: z)


def _pad_to(x, shape):
    return jnp.pad(x, [(0, s - d) for d, s in zip(x.shape, shape)])


def _pad_gate_cols(w, H, Hp):
    """(..., 4H) -> (..., 4Hp): zero-pad each of the 4 gate chunks to Hp lanes."""
    lead = w.shape[:-1]
    w4 = w.reshape(*lead, 4, H)
    w4 = jnp.pad(w4, [(0, 0)] * (len(lead) + 1) + [(0, Hp - H)])
    return w4.reshape(*lead, 4 * Hp)


def decoder_forward(features, poem_word_indices, lengths, p):
    """Forward pass matching the module's forward (eval mode): (B, L-1, vocab)."""
    B, _ = features.shape
    L = poem_word_indices.shape[1]
    T = L - 1
    V, E = p["embed_w"].shape
    H = p["w_hh_t"].shape[0]

    Bp = _round_up(B, 8)        # sublane-align the batch
    Hp = _round_up(H, 128)      # lane-align every gate chunk / hidden dim
    Vp = _round_up(V, 128)      # lane-dense (unmasked) output store

    # --- per-gate zero padding of the LSTM parameters (numerically exact) ---
    w_cell_t = _pad_gate_cols(p["w_cell_t"], H, Hp)                          # (F, 4Hp)
    b_cell = _pad_gate_cols(p["b_cell"], H, Hp)                              # (1, 4Hp)
    w_ih_t = _pad_gate_cols(p["w_ih_t"], H, Hp)                              # (E, 4Hp)
    w_hh_t = _pad_gate_cols(_pad_to(p["w_hh_t"], (Hp, 4 * H)), H, Hp)        # (Hp, 4Hp)
    b_lstm = _pad_gate_cols(p["b_lstm"], H, Hp)                              # (1, 4Hp)
    w_out_t = _pad_to(p["w_out_t"], (Hp, Vp))                                # (Hp, Vp)
    b_out = _pad_to(p["b_out"], (1, Vp))                                     # (1, Vp)

    # --- glue: embedding gather, time-major flatten, batch padding ---
    emb_bte = p["embed_w"][poem_word_indices[:, :T]]                         # (B, T, E)
    emb_tbe = jnp.transpose(emb_bte, (1, 0, 2))                              # (T, B, E)
    emb_tbe = jnp.pad(emb_tbe, [(0, 0), (0, Bp - B), (0, 0)])                # (T, Bp, E)
    emb_flat = emb_tbe.reshape(T * Bp, E)                                    # row = t*Bp + b

    feats_p = jnp.pad(features, [(0, Bp - B), (0, 0)])
    len_p = jnp.pad(lengths.astype(jnp.int32).reshape(B, 1),
                    [(0, Bp - B), (0, 0)])

    inputs = (feats_p, emb_flat, len_p,
              w_cell_t, b_cell, w_ih_t, w_hh_t, b_lstm, w_out_t, b_out)

    out_flat = pl.pallas_call(
        decoder_kernel,
        out_shape=jax.ShapeDtypeStruct((T * Bp, Vp), jnp.float32),
        grid=(1,),
        in_specs=[_full_spec(x.shape) for x in inputs],
        out_specs=_full_spec((T * Bp, Vp)),
        compiler_params=pltpu.CompilerParams(
            dimension_semantics=("arbitrary",)),
    )(*inputs)

    out = out_flat.reshape(T, Bp, Vp)[:, :B, :V]                             # unpad
    return jnp.transpose(out, (1, 0, 2))                                     # (B, T, V)


def reference_forward(features, emb_bte, lengths, p):
    """Pure-JAX reference mirroring the PyTorch forward (eval mode)."""
    H = p["w_hh_t"].shape[0]
    norm = jnp.sqrt(jnp.sum(features ** 2, -1, keepdims=True))
    feats = features / jnp.maximum(norm, 1e-12)
    g0 = feats @ p["w_cell_t"] + p["b_cell"]
    i0 = jax.nn.sigmoid(g0[:, :H])
    gg0 = jnp.tanh(g0[:, 2 * H:3 * H])
    o0 = jax.nn.sigmoid(g0[:, 3 * H:])
    c = i0 * gg0
    h = o0 * jnp.tanh(c)
    outs = []
    for t in range(emb_bte.shape[1]):
        x = emb_bte[:, t, :]
        g = x @ p["w_ih_t"] + h @ p["w_hh_t"] + p["b_lstm"]
        ig = jax.nn.sigmoid(g[:, :H])
        fg = jax.nn.sigmoid(g[:, H:2 * H])
        gg = jnp.tanh(g[:, 2 * H:3 * H])
        og = jax.nn.sigmoid(g[:, 3 * H:])
        c = fg * c + ig * gg
        h = og * jnp.tanh(c)
        mask = (t < lengths).astype(jnp.float32)[:, None]
        outs.append((h * mask) @ p["w_out_t"] + p["b_out"])
    return jnp.stack(outs, axis=1)


if __name__ == "__main__":
    # Small shapes consistent with the module.
    B = 2            # batch
    F = 64           # image feature size
    H = 32           # hidden_size == embed_size (weight tying)
    E = H
    V = 48           # vocab_size
    L = 8            # max caption length (incl. SOS/EOS)
    T = L - 1

    key = jax.random.PRNGKey(0)
    ks = jax.random.split(key, 16)

    def uni(k, shape, fan):
        b = 1.0 / np.sqrt(fan)
        return jax.random.uniform(k, shape, jnp.float32, -b, b)

    # Parameters (deterministic, PyTorch-like uniform init).
    embed_w = uni(ks[0], (V, E), E)            # nn.Embedding / tied Linear weight
    lin_b = uni(ks[1], (V,), H)                # Linear bias
    w_ih_lstm = uni(ks[2], (4 * H, E), H)      # nn.LSTM weight_ih_l0
    w_hh_lstm = uni(ks[3], (4 * H, H), H)      # nn.LSTM weight_hh_l0
    b_ih_lstm = uni(ks[4], (4 * H,), H)
    b_hh_lstm = uni(ks[5], (4 * H,), H)
    w_ih_cell = uni(ks[6], (4 * H, F), H)      # nn.LSTMCell weight_ih
    b_ih_cell = uni(ks[7], (4 * H,), H)
    b_hh_cell = uni(ks[8], (4 * H,), H)
    # (LSTMCell weight_hh contributes h0 @ W_hh with h0 == 0; it drops out exactly.)

    params = {
        "embed_w":  jnp.asarray(embed_w),                                # (V, E)
        "w_cell_t": jnp.asarray(w_ih_cell.T),                            # (F, 4H)
        "b_cell":   jnp.asarray((b_ih_cell + b_hh_cell).reshape(1, -1)), # (1, 4H)
        "w_ih_t":   jnp.asarray(w_ih_lstm.T),                            # (E, 4H)
        "w_hh_t":   jnp.asarray(w_hh_lstm.T),                            # (H, 4H)
        "b_lstm":   jnp.asarray((b_ih_lstm + b_hh_lstm).reshape(1, -1)), # (1, 4H)
        "w_out_t":  jnp.asarray(embed_w.T),                              # (H, V) tied
        "b_out":    jnp.asarray(lin_b.reshape(1, -1)),                   # (1, V)
    }

    # Inputs.
    features = jax.random.normal(ks[9], (B, F), jnp.float32)
    poem_word_indices = jax.random.randint(ks[10], (B, L), 0, V, jnp.int32)
    lengths = jnp.array([7, 5], dtype=jnp.int32)      # sorted descending, <= L-1

    out = decoder_forward(features, poem_word_indices, lengths, params)
    out = jax.block_until_ready(out)

    emb_bte = embed_w[poem_word_indices][:, :T, :]    # (B, T, E) for the reference
    ref = reference_forward(features, emb_bte, lengths, params)
    np.testing.assert_allclose(np.asarray(out), np.asarray(ref), rtol=1e-4, atol=1e-4)

    assert out.shape == (B, T, V)
    print("KERNEL_OK")
</pallas_src>

<mosaic_0001>
module attributes {stable_mosaic.version = 11 : i64} {
  func.func @decoder_kernel(%arg0: i32, %arg1: memref<8x64xf32, #tpu.memory_space<vmem>>, %arg2: memref<56x32xf32, #tpu.memory_space<vmem>>, %arg3: memref<8x1xi32, #tpu.memory_space<vmem>>, %arg4: memref<64x512xf32, #tpu.memory_space<vmem>>, %arg5: memref<1x512xf32, #tpu.memory_space<vmem>>, %arg6: memref<32x512xf32, #tpu.memory_space<vmem>>, %arg7: memref<128x512xf32, #tpu.memory_space<vmem>>, %arg8: memref<1x512xf32, #tpu.memory_space<vmem>>, %arg9: memref<128x128xf32, #tpu.memory_space<vmem>>, %arg10: memref<1x128xf32, #tpu.memory_space<vmem>>, %arg11: memref<56x128xf32, #tpu.memory_space<vmem>>) attributes {dimension_semantics = [#tpu.dimension_semantics<arbitrary>], iteration_bounds = array<i64: 1>, scalar_prefetch = 0 : i64, scratch_operands = 0 : i64, tpu.core_type = #tpu.core_type<tc>, window_params = [{pipeline_mode = #tpu.pipeline_mode<synchronous>, transform_indices = @transform_0, window_bounds = array<i64: 8, 64>}, {pipeline_mode = #tpu.pipeline_mode<synchronous>, transform_indices = @transform_1, window_bounds = array<i64: 56, 32>}, {pipeline_mode = #tpu.pipeline_mode<synchronous>, transform_indices = @transform_2, window_bounds = array<i64: 8, 1>}, {pipeline_mode = #tpu.pipeline_mode<synchronous>, transform_indices = @transform_3, window_bounds = array<i64: 64, 512>}, {pipeline_mode = #tpu.pipeline_mode<synchronous>, transform_indices = @transform_4, window_bounds = array<i64: 1, 512>}, {pipeline_mode = #tpu.pipeline_mode<synchronous>, transform_indices = @transform_5, window_bounds = array<i64: 32, 512>}, {pipeline_mode = #tpu.pipeline_mode<synchronous>, transform_indices = @transform_6, window_bounds = array<i64: 128, 512>}, {pipeline_mode = #tpu.pipeline_mode<synchronous>, transform_indices = @transform_7, window_bounds = array<i64: 1, 512>}, {pipeline_mode = #tpu.pipeline_mode<synchronous>, transform_indices = @transform_8, window_bounds = array<i64: 128, 128>}, {pipeline_mode = #tpu.pipeline_mode<synchronous>, transform_indices = @transform_9, window_bounds = array<i64: 1, 128>}, {pipeline_mode = #tpu.pipeline_mode<synchronous>, transform_indices = @transform_10, window_bounds = array<i64: 56, 128>}]} {
    %c0 = arith.constant 0 : index
    %c0_0 = arith.constant 0 : index
    %0 = vector.load %arg7[%c0, %c0_0] : memref<128x512xf32, #tpu.memory_space<vmem>>, vector<128x512xf32>
    %c0_1 = arith.constant 0 : index
    %c0_2 = arith.constant 0 : index
    %1 = vector.load %arg9[%c0_1, %c0_2] : memref<128x128xf32, #tpu.memory_space<vmem>>, vector<128x128xf32>
    %c0_3 = arith.constant 0 : index
    %c0_4 = arith.constant 0 : index
    %2 = vector.load %arg10[%c0_3, %c0_4] : memref<1x128xf32, #tpu.memory_space<vmem>>, vector<1x128xf32>
    %c0_5 = arith.constant 0 : index
    %c0_6 = arith.constant 0 : index
    %3 = vector.load %arg3[%c0_5, %c0_6] : memref<8x1xi32, #tpu.memory_space<vmem>>, vector<8x1xi32>
    %c0_7 = arith.constant 0 : index
    %c0_8 = arith.constant 0 : index
    %4 = vector.load %arg1[%c0_7, %c0_8] : memref<8x64xf32, #tpu.memory_space<vmem>>, vector<8x64xf32>
    %5 = arith.mulf %4, %4 : vector<8x64xf32>
    %cst = arith.constant dense<0.000000e+00> : vector<8xf32>
    %6 = vector.multi_reduction <add>, %5, %cst [1] : vector<8x64xf32> to vector<8xf32>
    %7 = vector.shape_cast %6 : vector<8xf32> to vector<8x1xf32>
    %cst_9 = arith.constant 1.000000e-24 : f32
    %8 = vector.broadcast %cst_9 : f32 to vector<8x1xf32>
    %9 = arith.maximumf %7, %8 : vector<8x1xf32>
    %10 = math.rsqrt %9 : vector<8x1xf32>
    %11 = vector.broadcast %10 : vector<8x1xf32> to vector<8x64xf32>
    %12 = arith.mulf %4, %11 : vector<8x64xf32>
    %c0_10 = arith.constant 0 : index
    %c0_11 = arith.constant 0 : index
    %13 = vector.load %arg4[%c0_10, %c0_11] : memref<64x512xf32, #tpu.memory_space<vmem>>, vector<64x512xf32>
    %cst_12 = arith.constant dense<0.000000e+00> : vector<8x512xf32>
    %14 = tpu.matmul %12, %13, %cst_12 {dimension_numbers = #tpu.dot_dimension_numbers<[1], [0], [0], [1], [0, 0, 1, 1], [], []>} : vector<8x64xf32>, vector<64x512xf32>, vector<8x512xf32> -> vector<8x512xf32>
    %c0_13 = arith.constant 0 : index
    %c0_14 = arith.constant 0 : index
    %15 = vector.load %arg5[%c0_13, %c0_14] : memref<1x512xf32, #tpu.memory_space<vmem>>, vector<1x512xf32>
    %16 = vector.broadcast %15 : vector<1x512xf32> to vector<8x512xf32>
    %17 = arith.addf %14, %16 : vector<8x512xf32>
    %18 = vector.extract_strided_slice %17 {offsets = [0, 0], sizes = [8, 128], strides = [1, 1]} : vector<8x512xf32> to vector<8x128xf32>
    %19 = arith.negf %18 : vector<8x128xf32>
    %20 = math.exp %19 : vector<8x128xf32>
    %cst_15 = arith.constant 1.000000e+00 : f32
    %21 = vector.broadcast %cst_15 : f32 to vector<8x128xf32>
    %22 = arith.addf %21, %20 : vector<8x128xf32>
    %23 = arith.divf %21, %22 : vector<8x128xf32>
    %24 = vector.extract_strided_slice %17 {offsets = [0, 256], sizes = [8, 128], strides = [1, 1]} : vector<8x512xf32> to vector<8x128xf32>
    %25 = math.tanh %24 : vector<8x128xf32>
    %26 = vector.extract_strided_slice %17 {offsets = [0, 384], sizes = [8, 128], strides = [1, 1]} : vector<8x512xf32> to vector<8x128xf32>
    %27 = arith.negf %26 : vector<8x128xf32>
    %28 = math.exp %27 : vector<8x128xf32>
    %cst_16 = arith.constant 1.000000e+00 : f32
    %29 = vector.broadcast %cst_16 : f32 to vector<8x128xf32>
    %30 = arith.addf %29, %28 : vector<8x128xf32>
    %31 = arith.divf %29, %30 : vector<8x128xf32>
    %32 = arith.mulf %23, %25 : vector<8x128xf32>
    %33 = math.tanh %32 : vector<8x128xf32>
    %34 = arith.mulf %31, %33 : vector<8x128xf32>
    %c0_17 = arith.constant 0 : index
    %c0_18 = arith.constant 0 : index
    %35 = vector.load %arg2[%c0_17, %c0_18] : memref<56x32xf32, #tpu.memory_space<vmem>>, vector<56x32xf32>
    %c0_19 = arith.constant 0 : index
    %c0_20 = arith.constant 0 : index
    %36 = vector.load %arg6[%c0_19, %c0_20] : memref<32x512xf32, #tpu.memory_space<vmem>>, vector<32x512xf32>
    %cst_21 = arith.constant dense<0.000000e+00> : vector<56x512xf32>
    %37 = tpu.matmul %35, %36, %cst_21 {dimension_numbers = #tpu.dot_dimension_numbers<[1], [0], [0], [1], [0, 0, 1, 1], [], []>} : vector<56x32xf32>, vector<32x512xf32>, vector<56x512xf32> -> vector<56x512xf32>
    %c0_22 = arith.constant 0 : index
    %c0_23 = arith.constant 0 : index
    %38 = vector.load %arg8[%c0_22, %c0_23] : memref<1x512xf32, #tpu.memory_space<vmem>>, vector<1x512xf32>
    %39 = vector.broadcast %38 : vector<1x512xf32> to vector<56x512xf32>
    %40 = arith.addf %37, %39 : vector<56x512xf32>
    %41 = vector.extract_strided_slice %40 {offsets = [0, 0], sizes = [8, 512], strides = [1, 1]} : vector<56x512xf32> to vector<8x512xf32>
    %cst_24 = arith.constant dense<0.000000e+00> : vector<8x512xf32>
    %42 = tpu.matmul %34, %0, %cst_24 {dimension_numbers = #tpu.dot_dimension_numbers<[1], [0], [0], [1], [0, 0, 1, 1], [], []>} : vector<8x128xf32>, vector<128x512xf32>, vector<8x512xf32> -> vector<8x512xf32>
    %43 = arith.addf %41, %42 : vector<8x512xf32>
    %44 = vector.extract_strided_slice %43 {offsets = [0, 0], sizes = [8, 128], strides = [1, 1]} : vector<8x512xf32> to vector<8x128xf32>
    %45 = arith.negf %44 : vector<8x128xf32>
    %46 = math.exp %45 : vector<8x128xf32>
    %cst_25 = arith.constant 1.000000e+00 : f32
    %47 = vector.broadcast %cst_25 : f32 to vector<8x128xf32>
    %48 = arith.addf %47, %46 : vector<8x128xf32>
    %49 = arith.divf %47, %48 : vector<8x128xf32>
    %50 = vector.extract_strided_slice %43 {offsets = [0, 128], sizes = [8, 128], strides = [1, 1]} : vector<8x512xf32> to vector<8x128xf32>
    %51 = arith.negf %50 : vector<8x128xf32>
    %52 = math.exp %51 : vector<8x128xf32>
    %cst_26 = arith.constant 1.000000e+00 : f32
    %53 = vector.broadcast %cst_26 : f32 to vector<8x128xf32>
    %54 = arith.addf %53, %52 : vector<8x128xf32>
    %55 = arith.divf %53, %54 : vector<8x128xf32>
    %56 = vector.extract_strided_slice %43 {offsets = [0, 256], sizes = [8, 128], strides = [1, 1]} : vector<8x512xf32> to vector<8x128xf32>
    %57 = math.tanh %56 : vector<8x128xf32>
    %58 = vector.extract_strided_slice %43 {offsets = [0, 384], sizes = [8, 128], strides = [1, 1]} : vector<8x512xf32> to vector<8x128xf32>
    %59 = arith.negf %58 : vector<8x128xf32>
    %60 = math.exp %59 : vector<8x128xf32>
    %cst_27 = arith.constant 1.000000e+00 : f32
    %61 = vector.broadcast %cst_27 : f32 to vector<8x128xf32>
    %62 = arith.addf %61, %60 : vector<8x128xf32>
    %63 = arith.divf %61, %62 : vector<8x128xf32>
    %64 = arith.mulf %55, %32 : vector<8x128xf32>
    %65 = arith.mulf %49, %57 : vector<8x128xf32>
    %66 = arith.addf %64, %65 : vector<8x128xf32>
    %67 = math.tanh %66 : vector<8x128xf32>
    %68 = arith.mulf %63, %67 : vector<8x128xf32>
    %c0_i32 = arith.constant 0 : i32
    %69 = vector.broadcast %c0_i32 : i32 to vector<8x1xi32>
    %70 = arith.cmpi sgt, %3, %69 : vector<8x1xi32>
    %71 = arith.extui %70 : vector<8x1xi1> to vector<8x1xi32>
    %72 = arith.sitofp %71 : vector<8x1xi32> to vector<8x1xf32>
    %73 = vector.broadcast %72 : vector<8x1xf32> to vector<8x128xf32>
    %74 = arith.mulf %68, %73 : vector<8x128xf32>
    %75 = vector.extract_strided_slice %40 {offsets = [8, 0], sizes = [8, 512], strides = [1, 1]} : vector<56x512xf32> to vector<8x512xf32>
    %cst_28 = arith.constant dense<0.000000e+00> : vector<8x512xf32>
    %76 = tpu.matmul %68, %0, %cst_28 {dimension_numbers = #tpu.dot_dimension_numbers<[1], [0], [0], [1], [0, 0, 1, 1], [], []>} : vector<8x128xf32>, vector<128x512xf32>, vector<8x512xf32> -> vector<8x512xf32>
    %77 = arith.addf %75, %76 : vector<8x512xf32>
    %78 = vector.extract_strided_slice %77 {offsets = [0, 0], sizes = [8, 128], strides = [1, 1]} : vector<8x512xf32> to vector<8x128xf32>
    %79 = arith.negf %78 : vector<8x128xf32>
    %80 = math.exp %79 : vector<8x128xf32>
    %cst_29 = arith.constant 1.000000e+00 : f32
    %81 = vector.broadcast %cst_29 : f32 to vector<8x128xf32>
    %82 = arith.addf %81, %80 : vector<8x128xf32>
    %83 = arith.divf %81, %82 : vector<8x128xf32>
    %84 = vector.extract_strided_slice %77 {offsets = [0, 128], sizes = [8, 128], strides = [1, 1]} : vector<8x512xf32> to vector<8x128xf32>
    %85 = arith.negf %84 : vector<8x128xf32>
    %86 = math.exp %85 : vector<8x128xf32>
    %cst_30 = arith.constant 1.000000e+00 : f32
    %87 = vector.broadcast %cst_30 : f32 to vector<8x128xf32>
    %88 = arith.addf %87, %86 : vector<8x128xf32>
    %89 = arith.divf %87, %88 : vector<8x128xf32>
    %90 = vector.extract_strided_slice %77 {offsets = [0, 256], sizes = [8, 128], strides = [1, 1]} : vector<8x512xf32> to vector<8x128xf32>
    %91 = math.tanh %90 : vector<8x128xf32>
    %92 = vector.extract_strided_slice %77 {offsets = [0, 384], sizes = [8, 128], strides = [1, 1]} : vector<8x512xf32> to vector<8x128xf32>
    %93 = arith.negf %92 : vector<8x128xf32>
    %94 = math.exp %93 : vector<8x128xf32>
    %cst_31 = arith.constant 1.000000e+00 : f32
    %95 = vector.broadcast %cst_31 : f32 to vector<8x128xf32>
    %96 = arith.addf %95, %94 : vector<8x128xf32>
    %97 = arith.divf %95, %96 : vector<8x128xf32>
    %98 = arith.mulf %89, %66 : vector<8x128xf32>
    %99 = arith.mulf %83, %91 : vector<8x128xf32>
    %100 = arith.addf %98, %99 : vector<8x128xf32>
    %101 = math.tanh %100 : vector<8x128xf32>
    %102 = arith.mulf %97, %101 : vector<8x128xf32>
    %c1_i32 = arith.constant 1 : i32
    %103 = vector.broadcast %c1_i32 : i32 to vector<8x1xi32>
    %104 = arith.cmpi sgt, %3, %103 : vector<8x1xi32>
    %105 = arith.extui %104 : vector<8x1xi1> to vector<8x1xi32>
    %106 = arith.sitofp %105 : vector<8x1xi32> to vector<8x1xf32>
    %107 = vector.broadcast %106 : vector<8x1xf32> to vector<8x128xf32>
    %108 = arith.mulf %102, %107 : vector<8x128xf32>
    %109 = vector.extract_strided_slice %40 {offsets = [16, 0], sizes = [8, 512], strides = [1, 1]} : vector<56x512xf32> to vector<8x512xf32>
    %cst_32 = arith.constant dense<0.000000e+00> : vector<8x512xf32>
    %110 = tpu.matmul %102, %0, %cst_32 {dimension_numbers = #tpu.dot_dimension_numbers<[1], [0], [0], [1], [0, 0, 1, 1], [], []>} : vector<8x128xf32>, vector<128x512xf32>, vector<8x512xf32> -> vector<8x512xf32>
    %111 = arith.addf %109, %110 : vector<8x512xf32>
    %112 = vector.extract_strided_slice %111 {offsets = [0, 0], sizes = [8, 128], strides = [1, 1]} : vector<8x512xf32> to vector<8x128xf32>
    %113 = arith.negf %112 : vector<8x128xf32>
    %114 = math.exp %113 : vector<8x128xf32>
    %cst_33 = arith.constant 1.000000e+00 : f32
    %115 = vector.broadcast %cst_33 : f32 to vector<8x128xf32>
    %116 = arith.addf %115, %114 : vector<8x128xf32>
    %117 = arith.divf %115, %116 : vector<8x128xf32>
    %118 = vector.extract_strided_slice %111 {offsets = [0, 128], sizes = [8, 128], strides = [1, 1]} : vector<8x512xf32> to vector<8x128xf32>
    %119 = arith.negf %118 : vector<8x128xf32>
    %120 = math.exp %119 : vector<8x128xf32>
    %cst_34 = arith.constant 1.000000e+00 : f32
    %121 = vector.broadcast %cst_34 : f32 to vector<8x128xf32>
    %122 = arith.addf %121, %120 : vector<8x128xf32>
    %123 = arith.divf %121, %122 : vector<8x128xf32>
    %124 = vector.extract_strided_slice %111 {offsets = [0, 256], sizes = [8, 128], strides = [1, 1]} : vector<8x512xf32> to vector<8x128xf32>
    %125 = math.tanh %124 : vector<8x128xf32>
    %126 = vector.extract_strided_slice %111 {offsets = [0, 384], sizes = [8, 128], strides = [1, 1]} : vector<8x512xf32> to vector<8x128xf32>
    %127 = arith.negf %126 : vector<8x128xf32>
    %128 = math.exp %127 : vector<8x128xf32>
    %cst_35 = arith.constant 1.000000e+00 : f32
    %129 = vector.broadcast %cst_35 : f32 to vector<8x128xf32>
    %130 = arith.addf %129, %128 : vector<8x128xf32>
    %131 = arith.divf %129, %130 : vector<8x128xf32>
    %132 = arith.mulf %123, %100 : vector<8x128xf32>
    %133 = arith.mulf %117, %125 : vector<8x128xf32>
    %134 = arith.addf %132, %133 : vector<8x128xf32>
    %135 = math.tanh %134 : vector<8x128xf32>
    %136 = arith.mulf %131, %135 : vector<8x128xf32>
    %c2_i32 = arith.constant 2 : i32
    %137 = vector.broadcast %c2_i32 : i32 to vector<8x1xi32>
    %138 = arith.cmpi sgt, %3, %137 : vector<8x1xi32>
    %139 = arith.extui %138 : vector<8x1xi1> to vector<8x1xi32>
    %140 = arith.sitofp %139 : vector<8x1xi32> to vector<8x1xf32>
    %141 = vector.broadcast %140 : vector<8x1xf32> to vector<8x128xf32>
    %142 = arith.mulf %136, %141 : vector<8x128xf32>
    %143 = vector.extract_strided_slice %40 {offsets = [24, 0], sizes = [8, 512], strides = [1, 1]} : vector<56x512xf32> to vector<8x512xf32>
    %cst_36 = arith.constant dense<0.000000e+00> : vector<8x512xf32>
    %144 = tpu.matmul %136, %0, %cst_36 {dimension_numbers = #tpu.dot_dimension_numbers<[1], [0], [0], [1], [0, 0, 1, 1], [], []>} : vector<8x128xf32>, vector<128x512xf32>, vector<8x512xf32> -> vector<8x512xf32>
    %145 = arith.addf %143, %144 : vector<8x512xf32>
    %146 = vector.extract_strided_slice %145 {offsets = [0, 0], sizes = [8, 128], strides = [1, 1]} : vector<8x512xf32> to vector<8x128xf32>
    %147 = arith.negf %146 : vector<8x128xf32>
    %148 = math.exp %147 : vector<8x128xf32>
    %cst_37 = arith.constant 1.000000e+00 : f32
    %149 = vector.broadcast %cst_37 : f32 to vector<8x128xf32>
    %150 = arith.addf %149, %148 : vector<8x128xf32>
    %151 = arith.divf %149, %150 : vector<8x128xf32>
    %152 = vector.extract_strided_slice %145 {offsets = [0, 128], sizes = [8, 128], strides = [1, 1]} : vector<8x512xf32> to vector<8x128xf32>
    %153 = arith.negf %152 : vector<8x128xf32>
    %154 = math.exp %153 : vector<8x128xf32>
    %cst_38 = arith.constant 1.000000e+00 : f32
    %155 = vector.broadcast %cst_38 : f32 to vector<8x128xf32>
    %156 = arith.addf %155, %154 : vector<8x128xf32>
    %157 = arith.divf %155, %156 : vector<8x128xf32>
    %158 = vector.extract_strided_slice %145 {offsets = [0, 256], sizes = [8, 128], strides = [1, 1]} : vector<8x512xf32> to vector<8x128xf32>
    %159 = math.tanh %158 : vector<8x128xf32>
    %160 = vector.extract_strided_slice %145 {offsets = [0, 384], sizes = [8, 128], strides = [1, 1]} : vector<8x512xf32> to vector<8x128xf32>
    %161 = arith.negf %160 : vector<8x128xf32>
    %162 = math.exp %161 : vector<8x128xf32>
    %cst_39 = arith.constant 1.000000e+00 : f32
    %163 = vector.broadcast %cst_39 : f32 to vector<8x128xf32>
    %164 = arith.addf %163, %162 : vector<8x128xf32>
    %165 = arith.divf %163, %164 : vector<8x128xf32>
    %166 = arith.mulf %157, %134 : vector<8x128xf32>
    %167 = arith.mulf %151, %159 : vector<8x128xf32>
    %168 = arith.addf %166, %167 : vector<8x128xf32>
    %169 = math.tanh %168 : vector<8x128xf32>
    %170 = arith.mulf %165, %169 : vector<8x128xf32>
    %c3_i32 = arith.constant 3 : i32
    %171 = vector.broadcast %c3_i32 : i32 to vector<8x1xi32>
    %172 = arith.cmpi sgt, %3, %171 : vector<8x1xi32>
    %173 = arith.extui %172 : vector<8x1xi1> to vector<8x1xi32>
    %174 = arith.sitofp %173 : vector<8x1xi32> to vector<8x1xf32>
    %175 = vector.broadcast %174 : vector<8x1xf32> to vector<8x128xf32>
    %176 = arith.mulf %170, %175 : vector<8x128xf32>
    %177 = vector.extract_strided_slice %40 {offsets = [32, 0], sizes = [8, 512], strides = [1, 1]} : vector<56x512xf32> to vector<8x512xf32>
    %cst_40 = arith.constant dense<0.000000e+00> : vector<8x512xf32>
    %178 = tpu.matmul %170, %0, %cst_40 {dimension_numbers = #tpu.dot_dimension_numbers<[1], [0], [0], [1], [0, 0, 1, 1], [], []>} : vector<8x128xf32>, vector<128x512xf32>, vector<8x512xf32> -> vector<8x512xf32>
    %179 = arith.addf %177, %178 : vector<8x512xf32>
    %180 = vector.extract_strided_slice %179 {offsets = [0, 0], sizes = [8, 128], strides = [1, 1]} : vector<8x512xf32> to vector<8x128xf32>
    %181 = arith.negf %180 : vector<8x128xf32>
    %182 = math.exp %181 : vector<8x128xf32>
    %cst_41 = arith.constant 1.000000e+00 : f32
    %183 = vector.broadcast %cst_41 : f32 to vector<8x128xf32>
    %184 = arith.addf %183, %182 : vector<8x128xf32>
    %185 = arith.divf %183, %184 : vector<8x128xf32>
    %186 = vector.extract_strided_slice %179 {offsets = [0, 128], sizes = [8, 128], strides = [1, 1]} : vector<8x512xf32> to vector<8x128xf32>
    %187 = arith.negf %186 : vector<8x128xf32>
    %188 = math.exp %187 : vector<8x128xf32>
    %cst_42 = arith.constant 1.000000e+00 : f32
    %189 = vector.broadcast %cst_42 : f32 to vector<8x128xf32>
    %190 = arith.addf %189, %188 : vector<8x128xf32>
    %191 = arith.divf %189, %190 : vector<8x128xf32>
    %192 = vector.extract_strided_slice %179 {offsets = [0, 256], sizes = [8, 128], strides = [1, 1]} : vector<8x512xf32> to vector<8x128xf32>
    %193 = math.tanh %192 : vector<8x128xf32>
    %194 = vector.extract_strided_slice %179 {offsets = [0, 384], sizes = [8, 128], strides = [1, 1]} : vector<8x512xf32> to vector<8x128xf32>
    %195 = arith.negf %194 : vector<8x128xf32>
    %196 = math.exp %195 : vector<8x128xf32>
    %cst_43 = arith.constant 1.000000e+00 : f32
    %197 = vector.broadcast %cst_43 : f32 to vector<8x128xf32>
    %198 = arith.addf %197, %196 : vector<8x128xf32>
    %199 = arith.divf %197, %198 : vector<8x128xf32>
    %200 = arith.mulf %191, %168 : vector<8x128xf32>
    %201 = arith.mulf %185, %193 : vector<8x128xf32>
    %202 = arith.addf %200, %201 : vector<8x128xf32>
    %203 = math.tanh %202 : vector<8x128xf32>
    %204 = arith.mulf %199, %203 : vector<8x128xf32>
    %c4_i32 = arith.constant 4 : i32
    %205 = vector.broadcast %c4_i32 : i32 to vector<8x1xi32>
    %206 = arith.cmpi sgt, %3, %205 : vector<8x1xi32>
    %207 = arith.extui %206 : vector<8x1xi1> to vector<8x1xi32>
    %208 = arith.sitofp %207 : vector<8x1xi32> to vector<8x1xf32>
    %209 = vector.broadcast %208 : vector<8x1xf32> to vector<8x128xf32>
    %210 = arith.mulf %204, %209 : vector<8x128xf32>
    %211 = vector.extract_strided_slice %40 {offsets = [40, 0], sizes = [8, 512], strides = [1, 1]} : vector<56x512xf32> to vector<8x512xf32>
    %cst_44 = arith.constant dense<0.000000e+00> : vector<8x512xf32>
    %212 = tpu.matmul %204, %0, %cst_44 {dimension_numbers = #tpu.dot_dimension_numbers<[1], [0], [0], [1], [0, 0, 1, 1], [], []>} : vector<8x128xf32>, vector<128x512xf32>, vector<8x512xf32> -> vector<8x512xf32>
    %213 = arith.addf %211, %212 : vector<8x512xf32>
    %214 = vector.extract_strided_slice %213 {offsets = [0, 0], sizes = [8, 128], strides = [1, 1]} : vector<8x512xf32> to vector<8x128xf32>
    %215 = arith.negf %214 : vector<8x128xf32>
    %216 = math.exp %215 : vector<8x128xf32>
    %cst_45 = arith.constant 1.000000e+00 : f32
    %217 = vector.broadcast %cst_45 : f32 to vector<8x128xf32>
    %218 = arith.addf %217, %216 : vector<8x128xf32>
    %219 = arith.divf %217, %218 : vector<8x128xf32>
    %220 = vector.extract_strided_slice %213 {offsets = [0, 128], sizes = [8, 128], strides = [1, 1]} : vector<8x512xf32> to vector<8x128xf32>
    %221 = arith.negf %220 : vector<8x128xf32>
    %222 = math.exp %221 : vector<8x128xf32>
    %cst_46 = arith.constant 1.000000e+00 : f32
    %223 = vector.broadcast %cst_46 : f32 to vector<8x128xf32>
    %224 = arith.addf %223, %222 : vector<8x128xf32>
    %225 = arith.divf %223, %224 : vector<8x128xf32>
    %226 = vector.extract_strided_slice %213 {offsets = [0, 256], sizes = [8, 128], strides = [1, 1]} : vector<8x512xf32> to vector<8x128xf32>
    %227 = math.tanh %226 : vector<8x128xf32>
    %228 = vector.extract_strided_slice %213 {offsets = [0, 384], sizes = [8, 128], strides = [1, 1]} : vector<8x512xf32> to vector<8x128xf32>
    %229 = arith.negf %228 : vector<8x128xf32>
    %230 = math.exp %229 : vector<8x128xf32>
    %cst_47 = arith.constant 1.000000e+00 : f32
    %231 = vector.broadcast %cst_47 : f32 to vector<8x128xf32>
    %232 = arith.addf %231, %230 : vector<8x128xf32>
    %233 = arith.divf %231, %232 : vector<8x128xf32>
    %234 = arith.mulf %225, %202 : vector<8x128xf32>
    %235 = arith.mulf %219, %227 : vector<8x128xf32>
    %236 = arith.addf %234, %235 : vector<8x128xf32>
    %237 = math.tanh %236 : vector<8x128xf32>
    %238 = arith.mulf %233, %237 : vector<8x128xf32>
    %c5_i32 = arith.constant 5 : i32
    %239 = vector.broadcast %c5_i32 : i32 to vector<8x1xi32>
    %240 = arith.cmpi sgt, %3, %239 : vector<8x1xi32>
    %241 = arith.extui %240 : vector<8x1xi1> to vector<8x1xi32>
    %242 = arith.sitofp %241 : vector<8x1xi32> to vector<8x1xf32>
    %243 = vector.broadcast %242 : vector<8x1xf32> to vector<8x128xf32>
    %244 = arith.mulf %238, %243 : vector<8x128xf32>
    %245 = vector.extract_strided_slice %40 {offsets = [48, 0], sizes = [8, 512], strides = [1, 1]} : vector<56x512xf32> to vector<8x512xf32>
    %cst_48 = arith.constant dense<0.000000e+00> : vector<8x512xf32>
    %246 = tpu.matmul %238, %0, %cst_48 {dimension_numbers = #tpu.dot_dimension_numbers<[1], [0], [0], [1], [0, 0, 1, 1], [], []>} : vector<8x128xf32>, vector<128x512xf32>, vector<8x512xf32> -> vector<8x512xf32>
    %247 = arith.addf %245, %246 : vector<8x512xf32>
    %248 = vector.extract_strided_slice %247 {offsets = [0, 0], sizes = [8, 128], strides = [1, 1]} : vector<8x512xf32> to vector<8x128xf32>
    %249 = arith.negf %248 : vector<8x128xf32>
    %250 = math.exp %249 : vector<8x128xf32>
    %cst_49 = arith.constant 1.000000e+00 : f32
    %251 = vector.broadcast %cst_49 : f32 to vector<8x128xf32>
    %252 = arith.addf %251, %250 : vector<8x128xf32>
    %253 = arith.divf %251, %252 : vector<8x128xf32>
    %254 = vector.extract_strided_slice %247 {offsets = [0, 128], sizes = [8, 128], strides = [1, 1]} : vector<8x512xf32> to vector<8x128xf32>
    %255 = arith.negf %254 : vector<8x128xf32>
    %256 = math.exp %255 : vector<8x128xf32>
    %cst_50 = arith.constant 1.000000e+00 : f32
    %257 = vector.broadcast %cst_50 : f32 to vector<8x128xf32>
    %258 = arith.addf %257, %256 : vector<8x128xf32>
    %259 = arith.divf %257, %258 : vector<8x128xf32>
    %260 = vector.extract_strided_slice %247 {offsets = [0, 256], sizes = [8, 128], strides = [1, 1]} : vector<8x512xf32> to vector<8x128xf32>
    %261 = math.tanh %260 : vector<8x128xf32>
    %262 = vector.extract_strided_slice %247 {offsets = [0, 384], sizes = [8, 128], strides = [1, 1]} : vector<8x512xf32> to vector<8x128xf32>
    %263 = arith.negf %262 : vector<8x128xf32>
    %264 = math.exp %263 : vector<8x128xf32>
    %cst_51 = arith.constant 1.000000e+00 : f32
    %265 = vector.broadcast %cst_51 : f32 to vector<8x128xf32>
    %266 = arith.addf %265, %264 : vector<8x128xf32>
    %267 = arith.divf %265, %266 : vector<8x128xf32>
    %268 = arith.mulf %259, %236 : vector<8x128xf32>
    %269 = arith.mulf %253, %261 : vector<8x128xf32>
    %270 = arith.addf %268, %269 : vector<8x128xf32>
    %271 = math.tanh %270 : vector<8x128xf32>
    %272 = arith.mulf %267, %271 : vector<8x128xf32>
    %c6_i32 = arith.constant 6 : i32
    %273 = vector.broadcast %c6_i32 : i32 to vector<8x1xi32>
    %274 = arith.cmpi sgt, %3, %273 : vector<8x1xi32>
    %275 = arith.extui %274 : vector<8x1xi1> to vector<8x1xi32>
    %276 = arith.sitofp %275 : vector<8x1xi32> to vector<8x1xf32>
    %277 = vector.broadcast %276 : vector<8x1xf32> to vector<8x128xf32>
    %278 = arith.mulf %272, %277 : vector<8x128xf32>
    %279 = tpu.concatenate %74, %108, %142, %176, %210, %244, %278 in 0 : vector<8x128xf32>, vector<8x128xf32>, vector<8x128xf32>, vector<8x128xf32>, vector<8x128xf32>, vector<8x128xf32>, vector<8x128xf32> -> vector<56x128xf32>
    %cst_52 = arith.constant dense<0.000000e+00> : vector<56x128xf32>
    %280 = tpu.matmul %279, %1, %cst_52 {dimension_numbers = #tpu.dot_dimension_numbers<[1], [0], [0], [1], [0, 0, 1, 1], [], []>} : vector<56x128xf32>, vector<128x128xf32>, vector<56x128xf32> -> vector<56x128xf32>
    %281 = vector.broadcast %2 : vector<1x128xf32> to vector<56x128xf32>
    %282 = arith.addf %280, %281 : vector<56x128xf32>
    %c0_53 = arith.constant 0 : index
    %c0_54 = arith.constant 0 : index
    %283 = vector.load %arg11[%c0_53, %c0_54] : memref<56x128xf32, #tpu.memory_space<vmem>>, vector<56x128xf32>
    tpu.vector_store %arg11[%c0_53, %c0_54], %282 {strides = array<i32>} : memref<56x128xf32, #tpu.memory_space<vmem>>, vector<56x128xf32>,
    return
  }
  func.func @transform_0(%arg0: i32) -> (i32, i32) {
    %c0_i32 = arith.constant 0 : i32
    %c0_i32_0 = arith.constant 0 : i32
    %c0_i32_1 = arith.constant 0 : i32
    return %c0_i32, %c0_i32_0 : i32, i32
  }
  func.func @transform_1(%arg0: i32) -> (i32, i32) {
    %c0_i32 = arith.constant 0 : i32
    %c0_i32_0 = arith.constant 0 : i32
    %c0_i32_1 = arith.constant 0 : i32
    return %c0_i32, %c0_i32_0 : i32, i32
  }
  func.func @transform_2(%arg0: i32) -> (i32, i32) {
    %c0_i32 = arith.constant 0 : i32
    %c0_i32_0 = arith.constant 0 : i32
    %c0_i32_1 = arith.constant 0 : i32
    return %c0_i32, %c0_i32_0 : i32, i32
  }
  func.func @transform_3(%arg0: i32) -> (i32, i32) {
    %c0_i32 = arith.constant 0 : i32
    %c0_i32_0 = arith.constant 0 : i32
    %c0_i32_1 = arith.constant 0 : i32
    return %c0_i32, %c0_i32_0 : i32, i32
  }
  func.func @transform_4(%arg0: i32) -> (i32, i32) {
    %c0_i32 = arith.constant 0 : i32
    %c0_i32_0 = arith.constant 0 : i32
    %c0_i32_1 = arith.constant 0 : i32
    return %c0_i32, %c0_i32_0 : i32, i32
  }
  func.func @transform_5(%arg0: i32) -> (i32, i32) {
    %c0_i32 = arith.constant 0 : i32
    %c0_i32_0 = arith.constant 0 : i32
    %c0_i32_1 = arith.constant 0 : i32
    return %c0_i32, %c0_i32_0 : i32, i32
  }
  func.func @transform_6(%arg0: i32) -> (i32, i32) {
    %c0_i32 = arith.constant 0 : i32
    %c0_i32_0 = arith.constant 0 : i32
    %c0_i32_1 = arith.constant 0 : i32
    return %c0_i32, %c0_i32_0 : i32, i32
  }
  func.func @transform_7(%arg0: i32) -> (i32, i32) {
    %c0_i32 = arith.constant 0 : i32
    %c0_i32_0 = arith.constant 0 : i32
    %c0_i32_1 = arith.constant 0 : i32
    return %c0_i32, %c0_i32_0 : i32, i32
  }
  func.func @transform_8(%arg0: i32) -> (i32, i32) {
    %c0_i32 = arith.constant 0 : i32
    %c0_i32_0 = arith.constant 0 : i32
    %c0_i32_1 = arith.constant 0 : i32
    return %c0_i32, %c0_i32_0 : i32, i32
  }
  func.func @transform_9(%arg0: i32) -> (i32, i32) {
    %c0_i32 = arith.constant 0 : i32
    %c0_i32_0 = arith.constant 0 : i32
    %c0_i32_1 = arith.constant 0 : i32
    return %c0_i32, %c0_i32_0 : i32, i32
  }
  func.func @transform_10(%arg0: i32) -> (i32, i32) {
    %c0_i32 = arith.constant 0 : i32
    %c0_i32_0 = arith.constant 0 : i32
    %c0_i32_1 = arith.constant 0 : i32
    return %c0_i32, %c0_i32_0 : i32, i32
  }
}

</mosaic_0001>

<bundles_post_ra>
// kernel: tpu_custom_call.1
= control target key start
LH: loop header
LB: loop body
LE: loop exit
PB: predicated region body
PF: predicated region fallthrough
CT: control target
= control target key end

     0   :  { %15 = vsyncpa [#allocation3], 0  ;;  %s3713_s0 = inlined_call_operand.vmem [shape: f32[8,64], index: 0, kind: input, shape index: {}]   ;;  %s3714_s1 = inlined_call_operand.vmem [shape: f32[56,32], index: 1, kind: input, shape index: {}]   ;;  %s3715_s2 = inlined_call_operand.vmem [shape: s32[8,1], index: 2, kind: input, shape index: {}]   ;;  %s3716_s3 = inlined_call_operand.hbm [shape: f32[64,512], index: 3, kind: input, shape index: {}]   ;;  %s3717_s4 = inlined_call_operand.vmem [shape: f32[1,512], index: 4, kind: input, shape index: {}]   ;;  %s3718_s5 = inlined_call_operand.hbm [shape: f32[32,512], index: 5, kind: input, shape index: {}]   ;;  %s3719_s6 = inlined_call_operand.hbm [shape: f32[128,512], index: 6, kind: input, shape index: {}]   ;;  %s3720_s7 = inlined_call_operand.vmem [shape: f32[1,512], index: 7, kind: input, shape index: {}]   ;;  %s3721_s8 = inlined_call_operand.hbm [shape: f32[128,128], index: 8, kind: input, shape index: {}]   ;;  %s3722_s9 = inlined_call_operand.vmem [shape: f32[1,128], index: 9, kind: input, shape index: {}]   ;;  %s3723_s10 = inlined_call_operand.hbm [shape: f32[56,128], index: 10, kind: output, shape index: {}]  }
   0x1   :  { %16 = vsyncpa [#allocation6], 0 }
   0x2   :  { %17 = vsyncpa [#allocation9], 0 }
   0x3   :  { %18 = vsyncpa [#allocation4], 0  ;;  %s3015_s13 = smov [#allocation5]   ;;  %s3016_s15 = smov [#allocation2]  }
   0x4   :  { %s44_s14 = sshll.u32 %s3015_s13, 4  ;;  %s30_s16 = sshll.u32 %s3016_s15, 4  ;;  %s45_s14 = int_to_ptr.vmem [resolvable:$true] %s44_s14  ;;  %s3083_s16 = int_to_ptr.vmem [resolvable:$true] %s30_s16 }
   0x5   :  { %s2897_s19 = scalar_lea.hbm %s3718_s5, 2048 }
   0x6   :  { %p2898_p0 = scmp.ne.s32.totalorder %s3718_s5, %s2897_s19  ;;  %p2901_p1 = scmp.lt.u32.totalorder %s2897_s19, %s3718_s5 }
   0x8   :  { %p2903_p2 = pnand %p2901_p1, %p2898_p0 }
   0xa   :  { %2906 = shalt.err (!%p2903_p2)
}
   0xb   :  { %s2907_s24 = scalar_lea.vmem %s45_s14, 2048  ;;  %p2912_p4 = scmp.lt.s32.totalorder %s45_s14, %s45_s14 }
   0xc   :  { %p2908_p3 = scmp.ne.s32.totalorder %s45_s14, %s2907_s24  ;;  %p2913_p5 = scmp.lt.s32.totalorder %s2907_s24, %s2907_s24 }
   0xe   :  { %p2914_p6 = por %p2913_p5, %p2912_p4 }
  0x10   :  { %p2915_p7 = pnand %p2914_p6, %p2908_p3 }
  0x12   :  { %2918 = shalt.err (!%p2915_p7)
}
  0x13   :  { %s3017_s25 = smov 512   ;;  %s3018_s26 = smov 32  }
  0x14   :  { %50 = dma.hbm_to_vmem [thread:$0]  %s3718_s5, 2048, %s45_s14, [#allocation6], %s3017_s25, %s3017_s25, %s3018_s26  }
  0x15   :  { %s2919_s11 = scalar_lea.hbm %s3716_s3, 4096 }
  0x16   :  { %p2920_p8 = scmp.ne.s32.totalorder %s3716_s3, %s2919_s11  ;;  %p2923_p9 = scmp.lt.u32.totalorder %s2919_s11, %s3716_s3 }
  0x18   :  { %p2925_p10 = pnand %p2923_p9, %p2920_p8 }
  0x1a   :  { %2928 = shalt.err (!%p2925_p10)
}
  0x1b   :  { %s2929_s18 = scalar_lea.vmem %s3083_s16, 4096  ;;  %p2934_p12 = scmp.lt.s32.totalorder %s3083_s16, %s3083_s16 }
  0x1c   :  { %p2930_p11 = scmp.ne.s32.totalorder %s3083_s16, %s2929_s18  ;;  %p2935_p13 = scmp.lt.s32.totalorder %s2929_s18, %s2929_s18 }
  0x1e   :  { %p2936_p0 = por %p2935_p13, %p2934_p12 }
  0x20   :  { %p2937_p1 = pnand %p2936_p0, %p2930_p11 }
  0x22   :  { %2940 = shalt.err (!%p2937_p1)
}
  0x23   :  { %36 = dma.hbm_to_vmem [thread:$0]  %s3716_s3, 4096, %s3083_s16, [#allocation3], %s3017_s25, %s3017_s25, %s3018_s26  }
  0x24   :  { %s3019_s19 = smov [#allocation7]   ;;  %s3020_s21 = smov [#allocation8]  }
  0x25   :  { %s56_s20 = sshll.u32 %s3019_s19, 4  ;;  %s70_s22 = sshll.u32 %s3020_s21, 4  ;;  %s57_s20 = int_to_ptr.vmem [resolvable:$true] %s56_s20  ;;  %s3120_s22 = int_to_ptr.vmem [resolvable:$true] %s70_s22 }
  0x26   :  { %s2941_s27 = scalar_lea.hbm %s3719_s6, 8192 }
  0x27   :  { %p2942_p2 = scmp.ne.s32.totalorder %s3719_s6, %s2941_s27  ;;  %p2945_p3 = scmp.lt.u32.totalorder %s2941_s27, %s3719_s6 }
  0x29   :  { %p2947_p4 = pnand %p2945_p3, %p2942_p2 }
  0x2b   :  { %2950 = shalt.err (!%p2947_p4)
}
  0x2c   :  { %s2951_s3 = scalar_lea.vmem %s57_s20, 8192  ;;  %p2956_p6 = scmp.lt.s32.totalorder %s57_s20, %s57_s20 }
  0x2d   :  { %p2952_p5 = scmp.ne.s32.totalorder %s57_s20, %s2951_s3  ;;  %p2957_p7 = scmp.lt.s32.totalorder %s2951_s3, %s2951_s3 }
  0x2f   :  { %p2958_p8 = por %p2957_p7, %p2956_p6 }
  0x31   :  { %p2959_p9 = pnand %p2958_p8, %p2952_p5 }
  0x33   :  { %2962 = shalt.err (!%p2959_p9)
}
  0x34   :  { %62 = dma.hbm_to_vmem [thread:$0]  %s3719_s6, 8192, %s57_s20, [#allocation6], %s3017_s25, %s3017_s25, %s3018_s26  }
  0x35   :  { %s2963_s17 = scalar_lea.hbm %s3721_s8, 2048 }
  0x36   :  { %p2964_p10 = scmp.ne.s32.totalorder %s3721_s8, %s2963_s17  ;;  %p2967_p11 = scmp.lt.u32.totalorder %s2963_s17, %s3721_s8 }
  0x38   :  { %p2969_p12 = pnand %p2967_p11, %p2964_p10 }
  0x3a   :  { %2972 = shalt.err (!%p2969_p12)
}
  0x3b   :  { %s2973_s21 = scalar_lea.vmem %s3120_s22, 2048  ;;  %p2978_p0 = scmp.lt.s32.totalorder %s3120_s22, %s3120_s22 }
  0x3c   :  { %p2974_p13 = scmp.ne.s32.totalorder %s3120_s22, %s2973_s21  ;;  %p2979_p1 = scmp.lt.s32.totalorder %s2973_s21, %s2973_s21 }
  0x3e   :  { %p2980_p2 = por %p2979_p1, %p2978_p0 }
  0x40   :  { %p2981_p3 = pnand %p2980_p2, %p2974_p13 }
  0x42   :  { %2984 = shalt.err (!%p2981_p3)
}
  0x43   :  { %s3021_s6 = smov 128   ;;  %s3022_s25 = smov 8  }
  0x44   :  { %76 = dma.hbm_to_vmem [thread:$0]  %s3721_s8, 2048, %s3120_s22, [#allocation9], %s3021_s6, %s3021_s6, %s3022_s25  }
  0x45   :  { %3007 = dma.done.wait [#allocation3], 4096  }
  0x46   :  { %3008 = vsyncadd [#allocation3], 4294963200 }
  0x47   :  { %3009 = dma.done.wait [#allocation6], 10240  }
  0x48   :  { %3010 = vsyncadd [#allocation6], 4294957056 }
  0x49   :  { %3011 = dma.done.wait [#allocation9], 2048  }
  0x4a   :  { %3012 = vsyncadd [#allocation9], 4294965248  ;;  %v3160_v0 = vld [vmem:[%s3713_s0] sm:$0xff]  ;;  %vm175_vm0 = vcmask 523264   ;;  %v183_v1 = vld [vmem:[#allocation2 + $0x8] sm:$0xff]  ;;  %v3023_v31 = vmov 0.0  }
  0x4b   :  { %v187_v2 = vld [vmem:[#allocation2 + $0x28] sm:$0xff]  ;;  %v174_v3 = vmul.f32 %v3160_v0, %v3160_v0  ;;  %v185_v5 = vld [vmem:[#allocation2 + $0x18] sm:$0xff]  ;;  %v182_v9 = vld [vmem:[#allocation2] sm:$0xff]  ;;  %298 = vmatprep.mubr.f32.mxu0 %v3023_v31  ;;  %368 = vmatprep.mubr.f32.mxu1 %v3023_v31  ;;  %vm436_vm1 = vcmask 261120   ;;  %vm3026_vm9 = vmmov 0  }
  0x4c   :  { %v2180_v4 = vpack.c.bf16 %v187_v2, %v183_v1  ;;  %v189_v6 = vld [vmem:[#allocation2 + $0x38] sm:$0xff]  ;;  %v186_v10 = vld [vmem:[#allocation2 + $0x20] sm:$0xff]  ;;  %v184_v11 = vld [vmem:[#allocation2 + $0x10] sm:$0xff] }
  0x4d   :  { %v2196_v7 = vpack.c.bf16 %v189_v6, %v185_v5  ;;  %v176_v8 = vsel %vm175_vm0, %v174_v3, 0.0  ;;  %v2182_v12 = vpack.c.bf16 %v186_v10, %v182_v9  ;;  %v188_v13 = vld [vmem:[#allocation2 + $0x30] sm:$0xff]  ;;  %v191_v15 = vld [vmem:[#allocation2 + $0x48] sm:$0xff]  ;;  %v193_v17 = vld [vmem:[#allocation2 + $0x58] sm:$0xff] }
  0x4e   :  { %2181 = vmatprep.subr.bf16.mxu0 %v2180_v4  ;;  %177 = vadd.xlane.f32.xlu0 %v176_v8  ;;  %v2198_v14 = vpack.c.bf16 %v188_v13, %v184_v11  ;;  %v195_v16 = vld [vmem:[#allocation2 + $0x68] sm:$0xff]  ;;  %v197_v19 = vld [vmem:[#allocation2 + $0x78] sm:$0xff]  ;;  %v190_v20 = vld [vmem:[#allocation2 + $0x40] sm:$0xff] }
  0x4f   :  { %2197 = vmatprep.subr.bf16.mxu1 %v2196_v7  ;;  %2183 = vmatpush1.bf16.msra.mxu0 %v2182_v12  ;;  %v2184_v18 = vpack.c.bf16 %v195_v16, %v191_v15  ;;  %v194_v21 = vld [vmem:[#allocation2 + $0x60] sm:$0xff]  ;;  %v2200_v22 = vpack.c.bf16 %v197_v19, %v193_v17  ;;  %v192_v24 = vld [vmem:[#allocation2 + $0x50] sm:$0xff]  ;;  %v199_v26 = vld [vmem:[#allocation2 + $0x88] sm:$0xff] }
  0x50   :  { %2199 = vmatpush1.bf16.msra.mxu1 %v2198_v14  ;;  %v2186_v23 = vpack.c.bf16 %v194_v21, %v190_v20  ;;  %v196_v25 = vld [vmem:[#allocation2 + $0x70] sm:$0xff]  ;;  %v203_v28 = vld [vmem:[#allocation2 + $0xa8] sm:$0xff]  ;;  %v201_v29 = vld [vmem:[#allocation2 + $0x98] sm:$0xff] }
  0x51   :  { %2185 = vmatprep.subr.bf16.mxu0 %v2184_v18  ;;  %v2202_v27 = vpack.c.bf16 %v196_v25, %v192_v24  ;;  %v205_v30 = vld [vmem:[#allocation2 + $0xb8] sm:$0xff]  ;;  %2201 = vmatprep.subr.bf16.mxu1 %v2200_v22  ;;  %v2188_v32 = vpack.c.bf16 %v203_v28, %v199_v26  ;;  %v198_v34 = vld [vmem:[#allocation2 + $0x80] sm:$0xff]  ;;  %v200_v36 = vld [vmem:[#allocation2 + $0x90] sm:$0xff] }
  0x52   :  { %v2204_v33 = vpack.c.bf16 %v205_v30, %v201_v29  ;;  %v202_v35 = vld [vmem:[#allocation2 + $0xa0] sm:$0xff]  ;;  %v204_v38 = vld [vmem:[#allocation2 + $0xb0] sm:$0xff]  ;;  %v207_v39 = vld [vmem:[#allocation2 + $0xc8] sm:$0xff] }
  0x53   :  { %2187 = vmatpush1.bf16.msra.mxu0 %v2186_v23  ;;  %v2190_v37 = vpack.c.bf16 %v202_v35, %v198_v34  ;;  %v211_v40 = vld [vmem:[#allocation2 + $0xe8] sm:$0xff]  ;;  %v2206_v41 = vpack.c.bf16 %v204_v38, %v200_v36  ;;  %v209_v43 = vld [vmem:[#allocation2 + $0xd8] sm:$0xff]  ;;  %v206_v45 = vld [vmem:[#allocation2 + $0xc0] sm:$0xff] }
  0x54   :  { %2203 = vmatpush1.bf16.msra.mxu1 %v2202_v27  ;;  %2189 = vmatprep.subr.bf16.mxu0 %v2188_v32  ;;  %v2192_v42 = vpack.c.bf16 %v211_v40, %v207_v39  ;;  %v213_v44 = vld [vmem:[#allocation2 + $0xf8] sm:$0xff]  ;;  %v210_v47 = vld [vmem:[#allocation2 + $0xe0] sm:$0xff]  ;;  %v208_v48 = vld [vmem:[#allocation2 + $0xd0] sm:$0xff] }
  0x55   :  { %2205 = vmatprep.subr.bf16.mxu1 %v2204_v33  ;;  %v2208_v46 = vpack.c.bf16 %v213_v44, %v209_v43  ;;  %v212_v49 = vld [vmem:[#allocation2 + $0xf0] sm:$0xff]  ;;  %v2194_v50 = vpack.c.bf16 %v210_v47, %v206_v45  ;;  %v401_v56 = vld [vmem:[#allocation5 + $0x18] sm:$0xff]  ;;  %v92_v4 = vld [vmem:[#allocation7 + $0x8] sm:$0xff] }
  0x56   :  { %v2210_v51 = vpack.c.bf16 %v212_v49, %v208_v48  ;;  %v405_v57 = vld [vmem:[#allocation5 + $0x38] sm:$0xff]  ;;  %v400_v59 = vld [vmem:[#allocation5 + $0x10] sm:$0xff]  ;;  %v96_v5 = vld [vmem:[#allocation7 + $0x28] sm:$0xff] }
  0x57   :  { %2191 = vmatpush1.bf16.msra.mxu0 %v2190_v37  ;;  %v2220_v58 = vpack.c.bf16 %v405_v57, %v401_v56  ;;  %v404_v60 = vld [vmem:[#allocation5 + $0x30] sm:$0xff]  ;;  %v409_v62 = vld [vmem:[#allocation5 + $0x58] sm:$0xff]  ;;  %v3172_v6 = vpack.c.bf16 %v96_v5, %v92_v4  ;;  %v91_v7 = vld [vmem:[#allocation7] sm:$0xff] }
  0x58   :  { %2207 = vmatpush1.bf16.msra.mxu1 %v2206_v41  ;;  %2193 = vmatprep.subr.bf16.mxu0 %v2192_v42  ;;  %v2222_v61 = vpack.c.bf16 %v404_v60, %v400_v59  ;;  %v413_v63 = vld [vmem:[#allocation5 + $0x78] sm:$0xff]  ;;  %v412_v2 = vld [vmem:[#allocation5 + $0x70] sm:$0xff]  ;;  %v95_v8 = vld [vmem:[#allocation7 + $0x20] sm:$0xff] }
  0x59   :  { %2209 = vmatprep.subr.bf16.mxu1 %v2208_v46  ;;  %v2224_v1 = vpack.c.bf16 %v413_v63, %v409_v62  ;;  %v3174_v9 = vpack.c.bf16 %v95_v8, %v91_v7  ;;  %v3180_v10 = vld [vmem:[%s3714_s1] sm:$0xff]  ;;  %v100_v11 = vld [vmem:[#allocation7 + $0x48] sm:$0xff]  ;;  %v3214_v30 = vld [vmem:[%s3714_s1 + $0x10] sm:$0xff] }
  0x5a   :  { %v104_v12 = vld [vmem:[#allocation7 + $0x68] sm:$0xff]  ;;  %v99_v14 = vld [vmem:[#allocation7 + $0x40] sm:$0xff]  ;;  %v3228_v38 = vld [vmem:[%s3714_s1 + $0x18] sm:$0xff] }
  0x5b   :  { %2195 = vmatpush1.bf16.msra.mxu0 %v2194_v50  ;;  %v3185_v13 = vpack.c.bf16 %v104_v12, %v100_v11  ;;  %v103_v15 = vld [vmem:[#allocation7 + $0x60] sm:$0xff]  ;;  %v108_v17 = vld [vmem:[#allocation7 + $0x88] sm:$0xff]  ;;  %v94_v8 = vld [vmem:[#allocation7 + $0x18] sm:$0xff] }
  0x5c   :  { %2211 = vmatpush1.bf16.msra.mxu1 %v2210_v51  ;;  %v3188_v16 = vpack.c.bf16 %v103_v15, %v99_v14  ;;  %v112_v18 = vld [vmem:[#allocation7 + $0xa8] sm:$0xff]  ;;  %v107_v20 = vld [vmem:[#allocation7 + $0x80] sm:$0xff]  ;;  %v98_v11 = vld [vmem:[#allocation7 + $0x38] sm:$0xff]  ;;  %v3024_v15 = vmov 0  }
  0x5d   :  { %2221 = vmatprep.subr.bf16.mxu1 %v2220_v58  ;;  %v3192_v19 = vpack.c.bf16 %v112_v18, %v108_v17  ;;  %v111_v21 = vld [vmem:[#allocation7 + $0xa0] sm:$0xff]  ;;  %v3200_v23 = vld [vmem:[%s3714_s1 + $0x8] sm:$0xff]  ;;  %v3266_v14 = vpack.c.bf16 %v98_v11, %v94_v8  ;;  %2769 = vset.pattern.permute.xlu0 %v3024_v15  ;;  %v216_v18 = vlaneseq  ;;  %v113_v8 = vld [vmem:[#allocation7 + $0xb0] sm:$0xff] }
  0x5e   :  { %v3194_v22 = vpack.c.bf16 %v111_v21, %v107_v20  ;;  %v116_v24 = vld [vmem:[#allocation7 + $0xc8] sm:$0xff]  ;;  %v115_v27 = vld [vmem:[#allocation7 + $0xc0] sm:$0xff]  ;;  %2770 = vset.pattern.permute.xlu1 %v3024_v15  ;;  %v118_v11 = vld [vmem:[#allocation7 + $0xd8] sm:$0xff] }
  0x5f   :  { %v120_v25 = vld [vmem:[#allocation7 + $0xe8] sm:$0xff]  ;;  %v119_v28 = vld [vmem:[#allocation7 + $0xe0] sm:$0xff]  ;;  %v3316_v20 = vshrl.u32 %v216_v18, 7  ;;  %v122_v15 = vld [vmem:[#allocation7 + $0xf8] sm:$0xff] }
  0x60   :  { %v3206_v26 = vpack.c.bf16 %v120_v25, %v116_v24  ;;  %v3208_v29 = vpack.c.bf16 %v119_v28, %v115_v27  ;;  %v124_v32 = vld [vmem:[#allocation7 + $0x108] sm:$0xff]  ;;  %v123_v35 = vld [vmem:[#allocation7 + $0x100] sm:$0xff]  ;;  %v3348_v18 = vpack.c.bf16 %v122_v15, %v118_v11 }
  0x61   :  { %v128_v33 = vld [vmem:[#allocation7 + $0x128] sm:$0xff]  ;;  %v127_v36 = vld [vmem:[#allocation7 + $0x120] sm:$0xff]  ;;  %v218_v21 = vsub.s32 0, %v3316_v20  ;;  %v226_v25 = vsub.s32 3, %v3316_v20 }
  0x62   :  { %v3220_v34 = vpack.c.bf16 %v128_v33, %v124_v32  ;;  %v3222_v37 = vpack.c.bf16 %v127_v36, %v123_v35  ;;  %v132_v39 = vld [vmem:[#allocation7 + $0x148] sm:$0xff]  ;;  %v131_v42 = vld [vmem:[#allocation7 + $0x140] sm:$0xff] }
  0x63   :  { %v136_v40 = vld [vmem:[#allocation7 + $0x168] sm:$0xff]  ;;  %v135_v43 = vld [vmem:[#allocation7 + $0x160] sm:$0xff] }
  0x64   :  { %v3234_v41 = vpack.c.bf16 %v136_v40, %v132_v39  ;;  %v3236_v44 = vpack.c.bf16 %v135_v43, %v131_v42  ;;  %v3242_v45 = vld [vmem:[%s3714_s1 + $0x20] sm:$0xff]  ;;  %v399_v46 = vld [vmem:[#allocation5 + $0x8] sm:$0xff] }
  0x65   :  { %v403_v47 = vld [vmem:[#allocation5 + $0x28] sm:$0xff]  ;;  %v398_v49 = vld [vmem:[#allocation5] sm:$0xff] }
  0x66   :  { %v2212_v48 = vpack.c.bf16 %v403_v47, %v399_v46  ;;  %v402_v50 = vld [vmem:[#allocation5 + $0x20] sm:$0xff]  ;;  %v140_v51 = vld [vmem:[#allocation7 + $0x188] sm:$0xff] }
  0x67   :  { %v143_v57 = vld [vmem:[#allocation7 + $0x1a0] sm:$0xff]  ;;  %v407_v58 = vld [vmem:[#allocation5 + $0x48] sm:$0xff] }
  0x68   :  { %2213 = vmatprep.subr.bf16.mxu0 %v2212_v48  ;;  %v411_v59 = vld [vmem:[#allocation5 + $0x68] sm:$0xff]  ;;  %v406_v62 = vld [vmem:[#allocation5 + $0x40] sm:$0xff] }
  0x69   :  { %v410_v63 = vld [vmem:[#allocation5 + $0x60] sm:$0xff] }
  0x6a   :  { %v147_v4 = vld [vmem:[#allocation7 + $0x1c0] sm:$0xff] }
  0x6b   :  { %v151_v7 = vld [vmem:[#allocation7 + $0x1e0] sm:$0xff] }
  0x6c   :  { %v3264_v12 = vpack.c.bf16 %v151_v7, %v147_v4  ;;  %v109_v7 = vld [vmem:[#allocation7 + $0x90] sm:$0xff] }
  0xdb   :  { %v178_v52 = vpop.xlane.xlu0 %177 }
  0xdc   :  { %v179_v53 = vmax.f32 %v178_v52, 1e-24  ;;  %v2214_v52 = vpack.c.bf16 %v402_v50, %v398_v49 }
  0xde   :  { %2771 = vrsqrt.f32 %v179_v53  ;;  %v144_v53 = vld [vmem:[#allocation7 + $0x1a8] sm:$0xff] }
  0xdf   :  { %v3251_v56 = vpack.c.bf16 %v144_v53, %v140_v51  ;;  %v97_v53 = vld [vmem:[#allocation7 + $0x30] sm:$0xff] }
  0xe8   :  { %v2772_v54 = vpop.eup %2771 }
  0xe9   :  { %v181_v55 = vmul.f32 %v2772_v54, %v3160_v0  ;;  %v408_v0 = vld [vmem:[#allocation5 + $0x50] sm:$0xff]  ;;  %v396_v54 = vld [vmem:[%s3714_s1 + $0x28] sm:$0xff] }
  0xea   :  { %v2226_v3 = vpack.c.bf16 %v412_v2, %v408_v0  ;;  %v2218_v0 = vpack.c.bf16 %v410_v63, %v406_v62  ;;  %v152_v2 = vld [vmem:[#allocation7 + $0x1e8] sm:$0xff]  ;;  %v101_v63 = vld [vmem:[#allocation7 + $0x50] sm:$0xff] }
  0xeb   :  { %2057 = vmatmul.mubr.msk.f32.vlgmr.msra.gmra.mrb[0].mxu0 %vm175_vm0, %v181_v55  ;;  %2058 = vmatmul.mubr.msk.f32.vlgmr.msra.gmra.mrb[0].mxu1 %vm175_vm0, %v181_v55  ;;  %v139_v55 = vld [vmem:[#allocation7 + $0x180] sm:$0xff] }
  0xec   :  { %629 = vmatprep.mubr.f32.mxu1 %v3023_v31  ;;  %522 = vmatprep.mubr.f32.mxu0 %v3023_v31  ;;  %v3253_v60 = vpack.c.bf16 %v143_v57, %v139_v55  ;;  %v106_v55 = vld [vmem:[#allocation7 + $0x78] sm:$0xff] }
  0xed   :  { %2223 = vmatpush1.bf16.msra.mxu1 %v2222_v61  ;;  %2215 = vmatpush1.bf16.msra.mxu0 %v2214_v52  ;;  %v2216_v61 = vpack.c.bf16 %v411_v59, %v407_v58  ;;  %v93_v52 = vld [vmem:[#allocation7 + $0x10] sm:$0xff] }
  0xee   :  { %2225 = vmatprep.subr.bf16.mxu1 %v2224_v1  ;;  %v148_v1 = vld [vmem:[#allocation7 + $0x1c8] sm:$0xff]  ;;  %v3333_v59 = vpack.c.bf16 %v97_v53, %v93_v52  ;;  %v145_v52 = vld [vmem:[#allocation7 + $0x1b0] sm:$0xff]  ;;  %v150_v53 = vld [vmem:[#allocation7 + $0x1d8] sm:$0xff] }
  0xef   :  { %2217 = vmatprep.subr.bf16.mxu0 %v2216_v61  ;;  %v3261_v5 = vpack.c.bf16 %v152_v2, %v148_v1  ;;  %v105_v1 = vld [vmem:[#allocation7 + $0x70] sm:$0xff]  ;;  %v114_v2 = vld [vmem:[#allocation7 + $0xb8] sm:$0xff] }
  0xf1   :  { %2227 = vmatpush1.bf16.msra.mxu1 %v2226_v3  ;;  %v397_v3 = vld [vmem:[%s3714_s1 + $0x30] sm:$0xff]  ;;  %2219 = vmatpush1.bf16.msra.mxu0 %v2218_v0  ;;  %v110_v0 = vld [vmem:[#allocation7 + $0x98] sm:$0xff] }
  0xf2   :  { %2229 = vmatprep.subr.bf16.mxu1 %v3172_v6  ;;  %2293 = vmatprep.subr.bf16.mxu0 %v3172_v6  ;;  %v3342_v4 = vpack.c.bf16 %v114_v2, %v110_v0 }
  0xf4   :  { %2068 = vmatmul.mubr.msk.f32.vlgmr.msra.gmra.mrb[2].mxu1 %vm436_vm1, %v3180_v10  ;;  %2061 = vmatmul.mubr.msk.f32.vlgmr.msra.gmra.mrb[2].mxu0 %vm436_vm1, %v3180_v10  ;;  %v3312_v10 = vld [vmem:[%s3715_s2] sm:$0xff] }
  0xf5   :  { %2231 = vmatpush1.bf16.msra.mxu1 %v3174_v9  ;;  %635 = vmatprep.mubr.f32.mxu1 %v3023_v31  ;;  %vm842_vm2 = vcmp.gt.s32.totalorder %v3312_v10, 0  ;;  %vm1021_vm3 = vcmp.gt.s32.totalorder %v3312_v10, 1  ;;  %vm1200_vm4 = vcmp.gt.s32.totalorder %v3312_v10, 2  ;;  %vm1379_vm5 = vcmp.gt.s32.totalorder %v3312_v10, 3 }
  0xf6   :  { %2233 = vmatprep.subr.bf16.mxu1 %v3185_v13  ;;  %2295 = vmatpush1.bf16.msra.mxu0 %v3174_v9  ;;  %v2078_v17 = vsel %vm842_vm2, 1.0, %v3023_v31  ;;  %v2082_v2 = vsel %vm1021_vm3, 1.0, %v3023_v31  ;;  %vm1558_vm6 = vcmp.gt.s32.totalorder %v3312_v10, 4  ;;  %vm1737_vm7 = vcmp.gt.s32.totalorder %v3312_v10, 5 }
  0xf7   :  { %528 = vmatprep.mubr.f32.mxu0 %v3023_v31  ;;  %2297 = vmatprep.subr.bf16.mxu0 %v3185_v13  ;;  %vm1916_vm8 = vcmp.gt.s32.totalorder %v3312_v10, 6 }
  0xf8   :  { %2069 = vmatmul.mubr.msk.f32.gmra.mrb[4].mxu1 %vm436_vm1, %v3200_v23  ;;  %2062 = vmatmul.mubr.msk.f32.gmra.mrb[4].mxu0 %vm436_vm1, %v3200_v23  ;;  %v214_v23 = vld [vmem:[%s3717_s4] sm:$0xf] }
  0xf9   :  { %2235 = vmatpush1.bf16.msra.mxu1 %v3188_v16  ;;  %641 = vmatprep.mubr.f32.mxu1 %v3023_v31  ;;  %v219_v24 = vrot.slane %v214_v23, %v218_v21  ;;  %v227_v33 = vrot.slane %v214_v23, %v226_v25 }
  0xfa   :  { %2237 = vmatprep.subr.bf16.mxu1 %v3192_v19  ;;  %2299 = vmatpush1.bf16.msra.mxu0 %v3188_v16 }
  0xfb   :  { %534 = vmatprep.mubr.f32.mxu0 %v3023_v31  ;;  %2301 = vmatprep.subr.bf16.mxu0 %v3192_v19 }
  0xfc   :  { %2070 = vmatmul.mubr.msk.f32.gmra.mrb[6].mxu1 %vm436_vm1, %v3214_v30  ;;  %2063 = vmatmul.mubr.msk.f32.gmra.mrb[6].mxu0 %vm436_vm1, %v3214_v30 }
  0xfd   :  { %2239 = vmatpush1.bf16.msra.mxu1 %v3194_v22  ;;  %647 = vmatprep.mubr.f32.mxu1 %v3023_v31 }
  0xfe   :  { %2241 = vmatprep.subr.bf16.mxu1 %v3206_v26  ;;  %2303 = vmatpush1.bf16.msra.mxu0 %v3194_v22 }
  0xff   :  { %540 = vmatprep.mubr.f32.mxu0 %v3023_v31  ;;  %2305 = vmatprep.subr.bf16.mxu0 %v3206_v26 }
 0x100   :  { %2071 = vmatmul.mubr.msk.f32.gmra.mrb[8].mxu1 %vm436_vm1, %v3228_v38  ;;  %2064 = vmatmul.mubr.msk.f32.gmra.mrb[8].mxu0 %vm436_vm1, %v3228_v38  ;;  %v222_v38 = vsub.s32 2, %v3316_v20 }
 0x101   :  { %2243 = vmatpush1.bf16.msra.mxu1 %v3208_v29  ;;  %653 = vmatprep.mubr.f32.mxu1 %v3023_v31 }
 0x102   :  { %2245 = vmatprep.subr.bf16.mxu1 %v3220_v34  ;;  %2307 = vmatpush1.bf16.msra.mxu0 %v3208_v29  ;;  %v223_v40 = vrot.slane %v214_v23, %v222_v38  ;;  %v117_v23 = vld [vmem:[#allocation7 + $0xd0] sm:$0xff] }
 0x103   :  { %546 = vmatprep.mubr.f32.mxu0 %v3023_v31  ;;  %2309 = vmatprep.subr.bf16.mxu0 %v3220_v34 }
 0x104   :  { %2072 = vmatmul.mubr.msk.f32.gmra.mrb[10].mxu1 %vm436_vm1, %v3242_v45  ;;  %2065 = vmatmul.mubr.msk.f32.gmra.mrb[10].mxu0 %vm436_vm1, %v3242_v45 }
 0x105   :  { %2247 = vmatpush1.bf16.msra.mxu1 %v3222_v37  ;;  %659 = vmatprep.mubr.f32.mxu1 %v3023_v31 }
 0x106   :  { %2249 = vmatprep.subr.bf16.mxu1 %v3234_v41  ;;  %2311 = vmatpush1.bf16.msra.mxu0 %v3222_v37 }
 0x107   :  { %552 = vmatprep.mubr.f32.mxu0 %v3023_v31  ;;  %2313 = vmatprep.subr.bf16.mxu0 %v3234_v41 }
 0x108   :  { %2073 = vmatmul.mubr.msk.f32.gmra.mrb[12].mxu1 %vm436_vm1, %v396_v54  ;;  %2066 = vmatmul.mubr.msk.f32.gmra.mrb[12].mxu0 %vm436_vm1, %v396_v54  ;;  %v102_v54 = vld [vmem:[#allocation7 + $0x58] sm:$0xff] }
 0x109   :  { %2251 = vmatpush1.bf16.msra.mxu1 %v3236_v44  ;;  %665 = vmatprep.mubr.f32.mxu1 %v3023_v31  ;;  %v3335_v62 = vpack.c.bf16 %v106_v55, %v102_v54  ;;  %v154_v54 = vld [vmem:[#allocation7 + $0x1f8] sm:$0xff] }
 0x10a   :  { %2253 = vmatprep.subr.bf16.mxu1 %v3251_v56  ;;  %2315 = vmatpush1.bf16.msra.mxu0 %v3236_v44 }
 0x10b   :  { %558 = vmatprep.mubr.f32.mxu0 %v3023_v31  ;;  %2317 = vmatprep.subr.bf16.mxu0 %v3251_v56 }
 0x10c   :  { %2074 = vmatmul.mubr.msk.f32.gmra.mrb[14].mxu1 %vm436_vm1, %v397_v3  ;;  %2067 = vmatmul.mubr.msk.f32.gmra.mrb[14].mxu0 %vm436_vm1, %v397_v3  ;;  %v3338_v3 = vpack.c.bf16 %v105_v1, %v101_v63  ;;  %v153_v63 = vld [vmem:[#allocation7 + $0x1f0] sm:$0xff] }
 0x10d   :  { %2255 = vmatpush1.bf16.msra.mxu1 %v3253_v60  ;;  %736 = vmatprep.mubr.f32.mxu1 %v3023_v31 }
 0x10e   :  { %2257 = vmatprep.subr.bf16.mxu1 %v3261_v5  ;;  %2319 = vmatpush1.bf16.msra.mxu0 %v3253_v60 }
 0x10f   :  { %915 = vmatprep.mubr.f32.mxu0 %v3023_v31  ;;  %2321 = vmatprep.subr.bf16.mxu0 %v3261_v5 }
 0x110   :  { %847 = vperm.xlu0 %2769, %v2078_v17   ;;  %v3345_v17 = vpack.c.bf16 %v113_v8, %v109_v7  ;;  %1026 = vperm.xlu1 %2770, %v2082_v2   ;;  %v414_v7 = vld [vmem:[%s3720_s7] sm:$0xf]  ;;  %v422_v8 = vsub.s32 1, %v3316_v20 }
 0x111   :  { %2259 = vmatpush1.bf16.msra.mxu1 %v3264_v12  ;;  %v3405_v11 = vrot.slane %v414_v7, %v218_v21  ;;  %v3413_v21 = vrot.slane %v414_v7, %v222_v38 }
 0x112   :  { %2261 = vmatprep.subr.bf16.mxu1 %v3266_v14  ;;  %2323 = vmatpush1.bf16.msra.mxu0 %v3264_v12  ;;  %v3407_v15 = vrot.slane %v414_v7, %v422_v8 }
 0x113   :  { %2357 = vmatprep.subr.bf16.mxu0 %v3172_v6 }
 0x1be   :  { %v300_v27 = vpop.f32.mrb[0].mxu0  ;;  %v370_v28 = vpop.f32.mrb[0].mxu1 }
 0x1bf   :  { %v301_v30 = vadd.f32 %v300_v27, %v219_v24  ;;  %v302_v32 = vpop.f32.mrb[1].mxu0  ;;  %v372_v35 = vpop.f32.mrb[1].mxu1  ;;  %v371_v43 = vadd.f32 %v370_v28, %v223_v40  ;;  %v121_v24 = vld [vmem:[#allocation7 + $0xf0] sm:$0xff]  ;;  %v126_v27 = vld [vmem:[#allocation7 + $0x118] sm:$0xff] }
 0x1c0   :  { %v373_v39 = vadd.f32 %v372_v35, %v227_v33  ;;  %v130_v28 = vld [vmem:[#allocation7 + $0x138] sm:$0xff]  ;;  %v125_v33 = vld [vmem:[#allocation7 + $0x110] sm:$0xff] }
 0x1c1   :  { %v2059_v36 = vmul.f32 -1.442695, %v301_v30  ;;  %v3351_v30 = vpack.c.bf16 %v121_v24, %v117_v23  ;;  %v3354_v32 = vpack.c.bf16 %v130_v28, %v126_v27  ;;  %v129_v35 = vld [vmem:[#allocation7 + $0x130] sm:$0xff] }
 0x1c2   :  { %v2060_v42 = vmul.f32 -1.442695, %v373_v39  ;;  %v138_v39 = vld [vmem:[#allocation7 + $0x178] sm:$0xff]  ;;  %v3357_v40 = vpack.c.bf16 %v129_v35, %v125_v33 }
 0x1c3   :  { %2773 = vpow2.f32 %v2059_v36  ;;  %v134_v36 = vld [vmem:[#allocation7 + $0x158] sm:$0xff] }
 0x1c4   :  { %2775 = vpow2.f32 %v2060_v42  ;;  %v3360_v42 = vpack.c.bf16 %v138_v39, %v134_v36 }
 0x1c5   :  { %2777 = vtanh.f32 %v371_v43  ;;  %v133_v43 = vld [vmem:[#allocation7 + $0x150] sm:$0xff] }
 0x1cd   :  { %v2774_v45 = vpop.eup %2773 }
 0x1ce   :  { %v378_v46 = vadd.f32 1.0, %v2774_v45  ;;  %v2776_v47 = vpop.eup %2775  ;;  %v137_v45 = vld [vmem:[#allocation7 + $0x170] sm:$0xff] }
 0x1cf   :  { %v385_v48 = vadd.f32 1.0, %v2776_v47  ;;  %v2778_v49 = vpop.eup %2777  ;;  %v146_v47 = vld [vmem:[#allocation7 + $0x1b8] sm:$0xff] }
 0x1d0   :  { %2779 = vrcp.f32 %v378_v46  ;;  %v142_v46 = vld [vmem:[#allocation7 + $0x198] sm:$0xff] }
 0x1d1   :  { %2781 = vrcp.f32 %v385_v48  ;;  %v3363_v48 = vpack.c.bf16 %v137_v45, %v133_v43 }
 0x1da   :  { %v2780_v50 = vpop.eup %2779 }
 0x1db   :  { %v3330_v51 = vmul.f32 %v2780_v50, %v2778_v49  ;;  %v2782_v57 = vpop.eup %2781  ;;  %v3366_v49 = vpack.c.bf16 %v146_v47, %v142_v46  ;;  %v141_v50 = vld [vmem:[#allocation7 + $0x190] sm:$0xff]  ;;  %v3417_v47 = vrot.slane %v414_v7, %v226_v25 }
 0x1dc   :  { %v3369_v55 = vpack.c.bf16 %v145_v52, %v141_v50 }
 0x1dd   :  { %2783 = vtanh.f32 %v3330_v51 }
 0x1e7   :  { %v2784_v58 = vpop.eup %2783 }
 0x1e8   :  { %v390_v61 = vmul.f32 %v2784_v58, %v2782_v57  ;;  %v3372_v57 = vpack.c.bf16 %v154_v54, %v150_v53  ;;  %v149_v58 = vld [vmem:[#allocation7 + $0x1d0] sm:$0xff] }
 0x1e9   :  { %v3375_v1 = vpack.c.bf16 %v153_v63, %v149_v58 }
 0x1ea   :  { %737 = vmatmul.mubr.f32.vlgmr.msra.gmra.mrb[16].mxu1 %v390_v61 }
 0x1eb   :  { %2263 = vmatpush1.bf16.msra.mxu1 %v3333_v59  ;;  %807 = vmatprep.mubr.f32.mxu1 %v3023_v31 }
 0x1ec   :  { %2265 = vmatprep.subr.bf16.mxu1 %v3335_v62 }
 0x1ef   :  { %2267 = vmatpush1.bf16.msra.mxu1 %v3338_v3 }
 0x1f0   :  { %2269 = vmatprep.subr.bf16.mxu1 %v3342_v4 }
 0x1f3   :  { %2271 = vmatpush1.bf16.msra.mxu1 %v3345_v17 }
 0x1f4   :  { %2273 = vmatprep.subr.bf16.mxu1 %v3348_v18 }
 0x1f7   :  { %2275 = vmatpush1.bf16.msra.mxu1 %v3351_v30 }
 0x1f8   :  { %2277 = vmatprep.subr.bf16.mxu1 %v3354_v32 }
 0x1fb   :  { %2279 = vmatpush1.bf16.msra.mxu1 %v3357_v40 }
 0x1fc   :  { %2281 = vmatprep.subr.bf16.mxu1 %v3360_v42 }
 0x1ff   :  { %2283 = vmatpush1.bf16.msra.mxu1 %v3363_v48 }
 0x200   :  { %2285 = vmatprep.subr.bf16.mxu1 %v3366_v49 }
 0x203   :  { %2287 = vmatpush1.bf16.msra.mxu1 %v3369_v55 }
 0x204   :  { %2289 = vmatprep.subr.bf16.mxu1 %v3372_v57 }
 0x207   :  { %2291 = vmatpush1.bf16.msra.mxu1 %v3375_v1 }
 0x208   :  { %2325 = vmatprep.subr.bf16.mxu1 %v3266_v14 }
 0x20a   :  { %808 = vmatmul.mubr.f32.vlgmr.msra.gmra.mrb[2].mxu1 %v390_v61  ;;  %v524_v61 = vpop.f32.mrb[2].mxu0 }
 0x20b   :  { %2327 = vmatpush1.bf16.msra.mxu1 %v3333_v59  ;;  %986 = vmatprep.mubr.f32.mxu1 %v3023_v31  ;;  %v526_v0 = vpop.f32.mrb[3].mxu0  ;;  %v525_v23 = vadd.f32 %v524_v61, %v3405_v11 }
 0x20c   :  { %2329 = vmatprep.subr.bf16.mxu1 %v3335_v62  ;;  %v527_v24 = vadd.f32 %v526_v0, %v3407_v15 }
 0x20f   :  { %2331 = vmatpush1.bf16.msra.mxu1 %v3338_v3 }
 0x210   :  { %2333 = vmatprep.subr.bf16.mxu1 %v3342_v4 }
 0x213   :  { %2335 = vmatpush1.bf16.msra.mxu1 %v3345_v17 }
 0x214   :  { %2337 = vmatprep.subr.bf16.mxu1 %v3348_v18 }
 0x217   :  { %2339 = vmatpush1.bf16.msra.mxu1 %v3351_v30 }
 0x218   :  { %2341 = vmatprep.subr.bf16.mxu1 %v3354_v32 }
 0x21b   :  { %2343 = vmatpush1.bf16.msra.mxu1 %v3357_v40 }
 0x21c   :  { %2345 = vmatprep.subr.bf16.mxu1 %v3360_v42 }
 0x21f   :  { %2347 = vmatpush1.bf16.msra.mxu1 %v3363_v48 }
 0x220   :  { %2349 = vmatprep.subr.bf16.mxu1 %v3366_v49 }
 0x223   :  { %2351 = vmatpush1.bf16.msra.mxu1 %v3369_v55 }
 0x224   :  { %2353 = vmatprep.subr.bf16.mxu1 %v3372_v57 }
 0x227   :  { %2355 = vmatpush1.bf16.msra.mxu1 %v3375_v1 }
 0x228   :  { %2389 = vmatprep.subr.bf16.mxu1 %v3266_v14 }
 0x2bd   :  { %v738_v27 = vpop.f32.mrb[16].mxu1 }
 0x2be   :  { %v814_v28 = vadd.f32 %v738_v27, %v525_v23  ;;  %v740_v33 = vpop.f32.mrb[17].mxu1 }
 0x2bf   :  { %v815_v35 = vadd.f32 %v740_v33, %v527_v24 }
 0x2c0   :  { %v2075_v39 = vmul.f32 -1.442695, %v814_v28 }
 0x2c1   :  { %v2076_v36 = vmul.f32 -1.442695, %v815_v35 }
 0x2c3   :  { %2785 = vpow2.f32 %v2076_v36 }
 0x2c4   :  { %2787 = vpow2.f32 %v2075_v39 }
 0x2cd   :  { %v2786_v43 = vpop.eup %2785 }
 0x2ce   :  { %v2788_v45 = vpop.eup %2787  ;;  %v827_v46 = vadd.f32 1.0, %v2786_v43 }
 0x2cf   :  { %v821_v50 = vadd.f32 1.0, %v2788_v45 }
 0x2d0   :  { %2789 = vrcp.f32 %v827_v46 }
 0x2d1   :  { %2791 = vrcp.f32 %v821_v50 }
 0x2da   :  { %v2790_v61 = vpop.eup %2789 }
 0x2db   :  { %v2792_v38 = vpop.eup %2791  ;;  %v837_v2 = vmul.f32 %v2790_v61, %v3330_v51  ;;  %v2086_v51 = vsel %vm1200_vm4, 1.0, %v3023_v31 }
 0x2dc   :  { %1205 = vperm.xlu1 %2770, %v2086_v51  }
 0x2dd   :  { %v809_v52 = vpop.f32.mrb[2].mxu1 }
 0x2de   :  { %v2716_v53 = vadd.f32 %v809_v52, %v3413_v21  ;;  %v811_v54 = vpop.f32.mrb[3].mxu1 }
 0x2df   :  { %v2717_v58 = vadd.f32 %v811_v54, %v3417_v47 }
 0x2e0   :  { %2793 = vtanh.f32 %v2716_v53 }
 0x2e1   :  { %v2077_v63 = vmul.f32 -1.442695, %v2717_v58 }
 0x2e3   :  { %2795 = vpow2.f32 %v2077_v63 }
 0x2ea   :  { %v2794_v0 = vpop.eup %2793 }
 0x2eb   :  { %v838_v20 = vmul.f32 %v2794_v0, %v2792_v38 }
 0x2ed   :  { %v2796_v25 = vpop.eup %2795  ;;  %v3422_v7 = vadd.f32 %v838_v20, %v837_v2 }
 0x2ee   :  { %v834_v8 = vadd.f32 1.0, %v2796_v25 }
 0x2ef   :  { %2797 = vtanh.f32 %v3422_v7 }
 0x2f0   :  { %2799 = vrcp.f32 %v834_v8 }
 0x2f9   :  { %v2798_v23 = vpop.eup %2797 }
 0x2fa   :  { %v2800_v24 = vpop.eup %2799 }
 0x2fb   :  { %v3425_v27 = vmul.f32 %v2800_v24, %v2798_v23 }
 0x2fd   :  { %916 = vmatmul.mubr.f32.vlgmr.msra.gmra.mrb[4].mxu0 %v3425_v27  ;;  %987 = vmatmul.mubr.f32.vlgmr.msra.gmra.mrb[4].mxu1 %v3425_v27 }
 0x2fe   :  { %2359 = vmatpush1.bf16.msra.mxu0 %v3174_v9  ;;  %2391 = vmatpush1.bf16.msra.mxu1 %v3333_v59 }
 0x2ff   :  { %2361 = vmatprep.subr.bf16.mxu0 %v3185_v13  ;;  %2393 = vmatprep.subr.bf16.mxu1 %v3335_v62 }
 0x300   :  { %1094 = vmatprep.mubr.f32.mxu0 %v3023_v31  ;;  %1165 = vmatprep.mubr.f32.mxu1 %v3023_v31 }
 0x302   :  { %2363 = vmatpush1.bf16.msra.mxu0 %v3188_v16  ;;  %2395 = vmatpush1.bf16.msra.mxu1 %v3338_v3 }
 0x303   :  { %2365 = vmatprep.subr.bf16.mxu0 %v3192_v19  ;;  %2397 = vmatprep.subr.bf16.mxu1 %v3342_v4 }
 0x306   :  { %2367 = vmatpush1.bf16.msra.mxu0 %v3194_v22  ;;  %2399 = vmatpush1.bf16.msra.mxu1 %v3345_v17 }
 0x307   :  { %2369 = vmatprep.subr.bf16.mxu0 %v3206_v26  ;;  %2401 = vmatprep.subr.bf16.mxu1 %v3348_v18 }
 0x30a   :  { %2371 = vmatpush1.bf16.msra.mxu0 %v3208_v29  ;;  %2403 = vmatpush1.bf16.msra.mxu1 %v3351_v30 }
 0x30b   :  { %2373 = vmatprep.subr.bf16.mxu0 %v3220_v34  ;;  %2405 = vmatprep.subr.bf16.mxu1 %v3354_v32 }
 0x30e   :  { %2375 = vmatpush1.bf16.msra.mxu0 %v3222_v37  ;;  %2407 = vmatpush1.bf16.msra.mxu1 %v3357_v40 }
 0x30f   :  { %2377 = vmatprep.subr.bf16.mxu0 %v3234_v41  ;;  %2409 = vmatprep.subr.bf16.mxu1 %v3360_v42 }
 0x312   :  { %2379 = vmatpush1.bf16.msra.mxu0 %v3236_v44  ;;  %2411 = vmatpush1.bf16.msra.mxu1 %v3363_v48 }
 0x313   :  { %2381 = vmatprep.subr.bf16.mxu0 %v3251_v56  ;;  %2413 = vmatprep.subr.bf16.mxu1 %v3366_v49 }
 0x316   :  { %2383 = vmatpush1.bf16.msra.mxu0 %v3253_v60  ;;  %2415 = vmatpush1.bf16.msra.mxu1 %v3369_v55 }
 0x317   :  { %2385 = vmatprep.subr.bf16.mxu0 %v3261_v5  ;;  %2417 = vmatprep.subr.bf16.mxu1 %v3372_v57 }
 0x31a   :  { %2387 = vmatpush1.bf16.msra.mxu0 %v3264_v12  ;;  %2419 = vmatpush1.bf16.msra.mxu1 %v3375_v1 }
 0x31b   :  { %2421 = vmatprep.subr.bf16.mxu0 %v3172_v6  ;;  %2453 = vmatprep.subr.bf16.mxu1 %v3266_v14 }
 0x3d0   :  { %v917_v28 = vpop.f32.mrb[4].mxu0  ;;  %v988_v33 = vpop.f32.mrb[4].mxu1 }
 0x3d1   :  { %v2704_v35 = vadd.f32 %v917_v28, %v3405_v11  ;;  %v919_v36 = vpop.f32.mrb[5].mxu0  ;;  %v990_v39 = vpop.f32.mrb[5].mxu1  ;;  %v2718_v53 = vadd.f32 %v988_v33, %v3413_v21 }
 0x3d2   :  { %v2705_v43 = vadd.f32 %v919_v36, %v3407_v15  ;;  %v2719_v50 = vadd.f32 %v990_v39, %v3417_v47 }
 0x3d3   :  { %v2079_v45 = vmul.f32 -1.442695, %v2704_v35 }
 0x3d4   :  { %v2080_v46 = vmul.f32 -1.442695, %v2705_v43  ;;  %v2081_v52 = vmul.f32 -1.442695, %v2719_v50 }
 0x3d5   :  { %2801 = vpow2.f32 %v2079_v45 }
 0x3d6   :  { %2803 = vpow2.f32 %v2080_v46 }
 0x3d7   :  { %2805 = vpow2.f32 %v2081_v52 }
 0x3d8   :  { %2807 = vtanh.f32 %v2718_v53 }
 0x3df   :  { %v2802_v54 = vpop.eup %2801 }
 0x3e0   :  { %v2804_v58 = vpop.eup %2803  ;;  %v1000_v63 = vadd.f32 1.0, %v2802_v54 }
 0x3e1   :  { %v1006_v61 = vadd.f32 1.0, %v2804_v58  ;;  %v2806_v38 = vpop.eup %2805 }
 0x3e2   :  { %2809 = vrcp.f32 %v1000_v63  ;;  %v2808_v0 = vpop.eup %2807  ;;  %v1013_v8 = vadd.f32 1.0, %v2806_v38 }
 0x3e3   :  { %2811 = vrcp.f32 %v1006_v61 }
 0x3e4   :  { %2813 = vrcp.f32 %v1013_v8 }
 0x3ec   :  { %v2810_v2 = vpop.eup %2809 }
 0x3ed   :  { %v2812_v20 = vpop.eup %2811  ;;  %v1017_v25 = vmul.f32 %v2810_v2, %v2808_v0 }
 0x3ee   :  { %v1016_v23 = vmul.f32 %v2812_v20, %v3422_v7  ;;  %v2814_v51 = vpop.eup %2813  ;;  %v2090_v7 = vsel %vm1379_vm5, 1.0, %v3023_v31 }
 0x3ef   :  { %1384 = vperm.xlu1 %2770, %v2090_v7  }
 0x3f0   :  { %v3470_v24 = vadd.f32 %v1017_v25, %v1016_v23 }
 0x3f2   :  { %2815 = vtanh.f32 %v3470_v24 }
 0x3fc   :  { %v2816_v28 = vpop.eup %2815 }
 0x3fd   :  { %v3473_v33 = vmul.f32 %v2816_v28, %v2814_v51 }
 0x3ff   :  { %1095 = vmatmul.mubr.f32.vlgmr.msra.gmra.mrb[6].mxu0 %v3473_v33  ;;  %1166 = vmatmul.mubr.f32.vlgmr.msra.gmra.mrb[6].mxu1 %v3473_v33 }
 0x400   :  { %2423 = vmatpush1.bf16.msra.mxu0 %v3174_v9  ;;  %2455 = vmatpush1.bf16.msra.mxu1 %v3333_v59 }
 0x401   :  { %2425 = vmatprep.subr.bf16.mxu0 %v3185_v13  ;;  %2457 = vmatprep.subr.bf16.mxu1 %v3335_v62 }
 0x402   :  { %1273 = vmatprep.mubr.f32.mxu0 %v3023_v31  ;;  %1344 = vmatprep.mubr.f32.mxu1 %v3023_v31 }
 0x404   :  { %2427 = vmatpush1.bf16.msra.mxu0 %v3188_v16  ;;  %2459 = vmatpush1.bf16.msra.mxu1 %v3338_v3 }
 0x405   :  { %2429 = vmatprep.subr.bf16.mxu0 %v3192_v19  ;;  %2461 = vmatprep.subr.bf16.mxu1 %v3342_v4 }
 0x408   :  { %2431 = vmatpush1.bf16.msra.mxu0 %v3194_v22  ;;  %2463 = vmatpush1.bf16.msra.mxu1 %v3345_v17 }
 0x409   :  { %2433 = vmatprep.subr.bf16.mxu0 %v3206_v26  ;;  %2465 = vmatprep.subr.bf16.mxu1 %v3348_v18 }
 0x40c   :  { %2435 = vmatpush1.bf16.msra.mxu0 %v3208_v29  ;;  %2467 = vmatpush1.bf16.msra.mxu1 %v3351_v30 }
 0x40d   :  { %2437 = vmatprep.subr.bf16.mxu0 %v3220_v34  ;;  %2469 = vmatprep.subr.bf16.mxu1 %v3354_v32 }
 0x410   :  { %2439 = vmatpush1.bf16.msra.mxu0 %v3222_v37  ;;  %2471 = vmatpush1.bf16.msra.mxu1 %v3357_v40 }
 0x411   :  { %2441 = vmatprep.subr.bf16.mxu0 %v3234_v41  ;;  %2473 = vmatprep.subr.bf16.mxu1 %v3360_v42 }
 0x414   :  { %2443 = vmatpush1.bf16.msra.mxu0 %v3236_v44  ;;  %2475 = vmatpush1.bf16.msra.mxu1 %v3363_v48 }
 0x415   :  { %2445 = vmatprep.subr.bf16.mxu0 %v3251_v56  ;;  %2477 = vmatprep.subr.bf16.mxu1 %v3366_v49 }
 0x418   :  { %2447 = vmatpush1.bf16.msra.mxu0 %v3253_v60  ;;  %2479 = vmatpush1.bf16.msra.mxu1 %v3369_v55 }
 0x419   :  { %2449 = vmatprep.subr.bf16.mxu0 %v3261_v5  ;;  %2481 = vmatprep.subr.bf16.mxu1 %v3372_v57 }
 0x41c   :  { %2451 = vmatpush1.bf16.msra.mxu0 %v3264_v12  ;;  %2483 = vmatpush1.bf16.msra.mxu1 %v3375_v1 }
 0x41d   :  { %2485 = vmatprep.subr.bf16.mxu0 %v3172_v6  ;;  %2517 = vmatprep.subr.bf16.mxu1 %v3266_v14 }
 0x4d2   :  { %v1096_v35 = vpop.f32.mrb[6].mxu0  ;;  %v1167_v36 = vpop.f32.mrb[6].mxu1 }
 0x4d3   :  { %v2706_v39 = vadd.f32 %v1096_v35, %v3405_v11  ;;  %v1098_v43 = vpop.f32.mrb[7].mxu0  ;;  %v1169_v45 = vpop.f32.mrb[7].mxu1  ;;  %v2720_v58 = vadd.f32 %v1167_v36, %v3413_v21 }
 0x4d4   :  { %v2707_v46 = vadd.f32 %v1098_v43, %v3407_v15  ;;  %v2721_v53 = vadd.f32 %v1169_v45, %v3417_v47 }
 0x4d5   :  { %v2083_v50 = vmul.f32 -1.442695, %v2706_v39 }
 0x4d6   :  { %v2084_v52 = vmul.f32 -1.442695, %v2707_v46  ;;  %v2085_v54 = vmul.f32 -1.442695, %v2721_v53 }
 0x4d7   :  { %2817 = vpow2.f32 %v2083_v50 }
 0x4d8   :  { %2819 = vpow2.f32 %v2084_v52 }
 0x4d9   :  { %2821 = vpow2.f32 %v2085_v54 }
 0x4da   :  { %2823 = vtanh.f32 %v2720_v58 }
 0x4e1   :  { %v2818_v63 = vpop.eup %2817 }
 0x4e2   :  { %v2820_v61 = vpop.eup %2819  ;;  %v1179_v38 = vadd.f32 1.0, %v2818_v63 }
 0x4e3   :  { %v1185_v0 = vadd.f32 1.0, %v2820_v61  ;;  %v2822_v2 = vpop.eup %2821 }
 0x4e4   :  { %2825 = vrcp.f32 %v1179_v38  ;;  %v2824_v20 = vpop.eup %2823  ;;  %v1192_v51 = vadd.f32 1.0, %v2822_v2 }
 0x4e5   :  { %2827 = vrcp.f32 %v1185_v0 }
 0x4e6   :  { %2829 = vrcp.f32 %v1192_v51 }
 0x4ee   :  { %v2826_v25 = vpop.eup %2825 }
 0x4ef   :  { %v2828_v8 = vpop.eup %2827  ;;  %v1196_v23 = vmul.f32 %v2826_v25, %v2824_v20 }
 0x4f0   :  { %v1195_v28 = vmul.f32 %v2828_v8, %v3470_v24  ;;  %v2830_v35 = vpop.eup %2829  ;;  %v2094_v24 = vsel %vm1558_vm6, 1.0, %v3023_v31 }
 0x4f1   :  { %1563 = vperm.xlu1 %2770, %v2094_v24  }
 0x4f2   :  { %v3518_v7 = vadd.f32 %v1196_v23, %v1195_v28 }
 0x4f4   :  { %2831 = vtanh.f32 %v3518_v7 }
 0x4fe   :  { %v2832_v36 = vpop.eup %2831 }
 0x4ff   :  { %v3521_v39 = vmul.f32 %v2832_v36, %v2830_v35 }
 0x501   :  { %1274 = vmatmul.mubr.f32.vlgmr.msra.gmra.mrb[8].mxu0 %v3521_v39  ;;  %1345 = vmatmul.mubr.f32.vlgmr.msra.gmra.mrb[8].mxu1 %v3521_v39 }
 0x502   :  { %2487 = vmatpush1.bf16.msra.mxu0 %v3174_v9  ;;  %2519 = vmatpush1.bf16.msra.mxu1 %v3333_v59 }
 0x503   :  { %2489 = vmatprep.subr.bf16.mxu0 %v3185_v13  ;;  %2521 = vmatprep.subr.bf16.mxu1 %v3335_v62 }
 0x504   :  { %1452 = vmatprep.mubr.f32.mxu0 %v3023_v31  ;;  %1523 = vmatprep.mubr.f32.mxu1 %v3023_v31 }
 0x506   :  { %2491 = vmatpush1.bf16.msra.mxu0 %v3188_v16  ;;  %2523 = vmatpush1.bf16.msra.mxu1 %v3338_v3 }
 0x507   :  { %2493 = vmatprep.subr.bf16.mxu0 %v3192_v19  ;;  %2525 = vmatprep.subr.bf16.mxu1 %v3342_v4 }
 0x50a   :  { %2495 = vmatpush1.bf16.msra.mxu0 %v3194_v22  ;;  %2527 = vmatpush1.bf16.msra.mxu1 %v3345_v17 }
 0x50b   :  { %2497 = vmatprep.subr.bf16.mxu0 %v3206_v26  ;;  %2529 = vmatprep.subr.bf16.mxu1 %v3348_v18 }
 0x50e   :  { %2499 = vmatpush1.bf16.msra.mxu0 %v3208_v29  ;;  %2531 = vmatpush1.bf16.msra.mxu1 %v3351_v30 }
 0x50f   :  { %2501 = vmatprep.subr.bf16.mxu0 %v3220_v34  ;;  %2533 = vmatprep.subr.bf16.mxu1 %v3354_v32 }
 0x512   :  { %2503 = vmatpush1.bf16.msra.mxu0 %v3222_v37  ;;  %2535 = vmatpush1.bf16.msra.mxu1 %v3357_v40 }
 0x513   :  { %2505 = vmatprep.subr.bf16.mxu0 %v3234_v41  ;;  %2537 = vmatprep.subr.bf16.mxu1 %v3360_v42 }
 0x516   :  { %2507 = vmatpush1.bf16.msra.mxu0 %v3236_v44  ;;  %2539 = vmatpush1.bf16.msra.mxu1 %v3363_v48 }
 0x517   :  { %2509 = vmatprep.subr.bf16.mxu0 %v3251_v56  ;;  %2541 = vmatprep.subr.bf16.mxu1 %v3366_v49 }
 0x51a   :  { %2511 = vmatpush1.bf16.msra.mxu0 %v3253_v60  ;;  %2543 = vmatpush1.bf16.msra.mxu1 %v3369_v55 }
 0x51b   :  { %2513 = vmatprep.subr.bf16.mxu0 %v3261_v5  ;;  %2545 = vmatprep.subr.bf16.mxu1 %v3372_v57 }
 0x51e   :  { %2515 = vmatpush1.bf16.msra.mxu0 %v3264_v12  ;;  %2547 = vmatpush1.bf16.msra.mxu1 %v3375_v1 }
 0x51f   :  { %2549 = vmatprep.subr.bf16.mxu0 %v3172_v6  ;;  %2581 = vmatprep.subr.bf16.mxu1 %v3266_v14 }
 0x5d4   :  { %v1275_v43 = vpop.f32.mrb[8].mxu0  ;;  %v1346_v45 = vpop.f32.mrb[8].mxu1 }
 0x5d5   :  { %v2708_v46 = vadd.f32 %v1275_v43, %v3405_v11  ;;  %v1277_v50 = vpop.f32.mrb[9].mxu0  ;;  %v1348_v52 = vpop.f32.mrb[9].mxu1  ;;  %v2722_v38 = vadd.f32 %v1346_v45, %v3413_v21 }
 0x5d6   :  { %v2709_v53 = vadd.f32 %v1277_v50, %v3407_v15  ;;  %v2723_v63 = vadd.f32 %v1348_v52, %v3417_v47 }
 0x5d7   :  { %v2087_v54 = vmul.f32 -1.442695, %v2708_v46 }
 0x5d8   :  { %v2088_v58 = vmul.f32 -1.442695, %v2709_v53  ;;  %v2089_v61 = vmul.f32 -1.442695, %v2723_v63 }
 0x5d9   :  { %2833 = vpow2.f32 %v2087_v54 }
 0x5da   :  { %2835 = vpow2.f32 %v2088_v58 }
 0x5db   :  { %2837 = vpow2.f32 %v2089_v61 }
 0x5dc   :  { %2839 = vtanh.f32 %v2722_v38 }
 0x5e3   :  { %v2834_v0 = vpop.eup %2833 }
 0x5e4   :  { %v2836_v2 = vpop.eup %2835  ;;  %v1358_v20 = vadd.f32 1.0, %v2834_v0 }
 0x5e5   :  { %v1364_v25 = vadd.f32 1.0, %v2836_v2  ;;  %v2838_v8 = vpop.eup %2837 }
 0x5e6   :  { %2841 = vrcp.f32 %v1358_v20  ;;  %v2840_v23 = vpop.eup %2839  ;;  %v1371_v36 = vadd.f32 1.0, %v2838_v8 }
 0x5e7   :  { %2843 = vrcp.f32 %v1364_v25 }
 0x5e8   :  { %2845 = vrcp.f32 %v1371_v36 }
 0x5f0   :  { %v2842_v51 = vpop.eup %2841 }
 0x5f1   :  { %v2844_v28 = vpop.eup %2843  ;;  %v1375_v35 = vmul.f32 %v2842_v51, %v2840_v23 }
 0x5f2   :  { %v1374_v24 = vmul.f32 %v2844_v28, %v3518_v7  ;;  %v2846_v45 = vpop.eup %2845  ;;  %v2098_v7 = vsel %vm1737_vm7, 1.0, %v3023_v31 }
 0x5f3   :  { %1742 = vperm.xlu1 %2770, %v2098_v7  }
 0x5f4   :  { %v3566_v43 = vadd.f32 %v1375_v35, %v1374_v24 }
 0x5f6   :  { %2847 = vtanh.f32 %v3566_v43 }
 0x600   :  { %v2848_v46 = vpop.eup %2847 }
 0x601   :  { %v3569_v50 = vmul.f32 %v2848_v46, %v2846_v45 }
 0x603   :  { %1453 = vmatmul.mubr.f32.vlgmr.msra.gmra.mrb[10].mxu0 %v3569_v50  ;;  %1524 = vmatmul.mubr.f32.vlgmr.msra.gmra.mrb[10].mxu1 %v3569_v50 }
 0x604   :  { %2551 = vmatpush1.bf16.msra.mxu0 %v3174_v9  ;;  %2583 = vmatpush1.bf16.msra.mxu1 %v3333_v59 }
 0x605   :  { %2553 = vmatprep.subr.bf16.mxu0 %v3185_v13  ;;  %2585 = vmatprep.subr.bf16.mxu1 %v3335_v62 }
 0x606   :  { %1631 = vmatprep.mubr.f32.mxu0 %v3023_v31  ;;  %1702 = vmatprep.mubr.f32.mxu1 %v3023_v31 }
 0x608   :  { %2555 = vmatpush1.bf16.msra.mxu0 %v3188_v16  ;;  %2587 = vmatpush1.bf16.msra.mxu1 %v3338_v3 }
 0x609   :  { %2557 = vmatprep.subr.bf16.mxu0 %v3192_v19  ;;  %2589 = vmatprep.subr.bf16.mxu1 %v3342_v4 }
 0x60c   :  { %2559 = vmatpush1.bf16.msra.mxu0 %v3194_v22  ;;  %2591 = vmatpush1.bf16.msra.mxu1 %v3345_v17 }
 0x60d   :  { %2561 = vmatprep.subr.bf16.mxu0 %v3206_v26  ;;  %2593 = vmatprep.subr.bf16.mxu1 %v3348_v18 }
 0x610   :  { %2563 = vmatpush1.bf16.msra.mxu0 %v3208_v29  ;;  %2595 = vmatpush1.bf16.msra.mxu1 %v3351_v30 }
 0x611   :  { %2565 = vmatprep.subr.bf16.mxu0 %v3220_v34  ;;  %2597 = vmatprep.subr.bf16.mxu1 %v3354_v32 }
 0x614   :  { %2567 = vmatpush1.bf16.msra.mxu0 %v3222_v37  ;;  %2599 = vmatpush1.bf16.msra.mxu1 %v3357_v40 }
 0x615   :  { %2569 = vmatprep.subr.bf16.mxu0 %v3234_v41  ;;  %2601 = vmatprep.subr.bf16.mxu1 %v3360_v42 }
 0x618   :  { %2571 = vmatpush1.bf16.msra.mxu0 %v3236_v44  ;;  %2603 = vmatpush1.bf16.msra.mxu1 %v3363_v48 }
 0x619   :  { %2573 = vmatprep.subr.bf16.mxu0 %v3251_v56  ;;  %2605 = vmatprep.subr.bf16.mxu1 %v3366_v49 }
 0x61c   :  { %2575 = vmatpush1.bf16.msra.mxu0 %v3253_v60  ;;  %2607 = vmatpush1.bf16.msra.mxu1 %v3369_v55 }
 0x61d   :  { %2577 = vmatprep.subr.bf16.mxu0 %v3261_v5  ;;  %2609 = vmatprep.subr.bf16.mxu1 %v3372_v57 }
 0x620   :  { %2579 = vmatpush1.bf16.msra.mxu0 %v3264_v12  ;;  %2611 = vmatpush1.bf16.msra.mxu1 %v3375_v1 }
 0x621   :  { %2613 = vmatprep.subr.bf16.mxu0 %v3172_v6  ;;  %2645 = vmatprep.subr.bf16.mxu1 %v3266_v14 }
 0x6d6   :  { %v1454_v52 = vpop.f32.mrb[10].mxu0  ;;  %v1525_v53 = vpop.f32.mrb[10].mxu1 }
 0x6d7   :  { %v2710_v54 = vadd.f32 %v1454_v52, %v3405_v11  ;;  %v1456_v58 = vpop.f32.mrb[11].mxu0  ;;  %v1527_v63 = vpop.f32.mrb[11].mxu1  ;;  %v2724_v2 = vadd.f32 %v1525_v53, %v3413_v21 }
 0x6d8   :  { %v2711_v61 = vadd.f32 %v1456_v58, %v3407_v15  ;;  %v2725_v6 = vadd.f32 %v1527_v63, %v3417_v47  ;;  %v158_v58 = vld [vmem:[#allocation8 + $0x18] sm:$0xff] }
 0x6d9   :  { %v2091_v38 = vmul.f32 -1.442695, %v2710_v54 }
 0x6da   :  { %v2092_v0 = vmul.f32 -1.442695, %v2711_v61  ;;  %v2093_v14 = vmul.f32 -1.442695, %v2725_v6  ;;  %v159_v61 = vld [vmem:[#allocation8 + $0x20] sm:$0xff]  ;;  %v161_v6 = vld [vmem:[#allocation8 + $0x30] sm:$0xff] }
 0x6db   :  { %2849 = vpow2.f32 %v2091_v38  ;;  %v160_v38 = vld [vmem:[#allocation8 + $0x28] sm:$0xff] }
 0x6dc   :  { %2851 = vpow2.f32 %v2092_v0  ;;  %v2683_v0 = vpack.c.bf16 %v160_v38, %v159_v61 }
 0x6dd   :  { %2853 = vpow2.f32 %v2093_v14  ;;  %v162_v14 = vld [vmem:[#allocation8 + $0x38] sm:$0xff] }
 0x6de   :  { %2855 = vtanh.f32 %v2724_v2  ;;  %v2686_v2 = vpack.c.bf16 %v162_v14, %v161_v6 }
 0x6e5   :  { %v2850_v20 = vpop.eup %2849 }
 0x6e6   :  { %v2852_v25 = vpop.eup %2851  ;;  %v1537_v8 = vadd.f32 1.0, %v2850_v20  ;;  %v163_v20 = vld [vmem:[#allocation8 + $0x40] sm:$0xff] }
 0x6e7   :  { %v1543_v23 = vadd.f32 1.0, %v2852_v25  ;;  %v2854_v51 = vpop.eup %2853  ;;  %v164_v25 = vld [vmem:[#allocation8 + $0x48] sm:$0xff] }
 0x6e8   :  { %2857 = vrcp.f32 %v1537_v8  ;;  %v2856_v28 = vpop.eup %2855  ;;  %v1550_v45 = vadd.f32 1.0, %v2854_v51  ;;  %v2689_v8 = vpack.c.bf16 %v164_v25, %v163_v20  ;;  %v166_v51 = vld [vmem:[#allocation8 + $0x58] sm:$0xff] }
 0x6e9   :  { %2859 = vrcp.f32 %v1543_v23  ;;  %v165_v23 = vld [vmem:[#allocation8 + $0x50] sm:$0xff] }
 0x6ea   :  { %2861 = vrcp.f32 %v1550_v45  ;;  %v169_v45 = vld [vmem:[#allocation8 + $0x70] sm:$0xff] }
 0x6f2   :  { %v2858_v35 = vpop.eup %2857 }
 0x6f3   :  { %v2860_v36 = vpop.eup %2859  ;;  %v1554_v24 = vmul.f32 %v2858_v35, %v2856_v28  ;;  %v2692_v28 = vpack.c.bf16 %v166_v51, %v165_v23  ;;  %v167_v35 = vld [vmem:[#allocation8 + $0x60] sm:$0xff] }
 0x6f4   :  { %v1553_v46 = vmul.f32 %v2860_v36, %v3566_v43  ;;  %v2862_v52 = vpop.eup %2861  ;;  %v157_v43 = vld [vmem:[#allocation8 + $0x10] sm:$0xff]  ;;  %v168_v36 = vld [vmem:[#allocation8 + $0x68] sm:$0xff] }
 0x6f5   :  { %v2680_v63 = vpack.c.bf16 %v158_v58, %v157_v43 }
 0x6f6   :  { %v3614_v7 = vadd.f32 %v1554_v24, %v1553_v46  ;;  %v2695_v24 = vpack.c.bf16 %v168_v36, %v167_v35  ;;  %v170_v46 = vld [vmem:[#allocation8 + $0x78] sm:$0xff] }
 0x6f8   :  { %2863 = vtanh.f32 %v3614_v7 }
 0x702   :  { %v2864_v53 = vpop.eup %2863 }
 0x703   :  { %v3617_v54 = vmul.f32 %v2864_v53, %v2862_v52  ;;  %v848_v52 = vpop.permute.xlu0 %847 }
 0x704   :  { %v850_v53 = vmul.f32 %v848_v52, %v3425_v27 }
 0x705   :  { %1632 = vmatmul.mubr.f32.vlgmr.msra.gmra.mrb[12].mxu0 %v3617_v54  ;;  %1703 = vmatmul.mubr.f32.vlgmr.msra.gmra.mrb[12].mxu1 %v3617_v54 }
 0x706   :  { %2615 = vmatpush1.bf16.msra.mxu0 %v3174_v9  ;;  %2647 = vmatpush1.bf16.msra.mxu1 %v3333_v59  ;;  %v3025_v9 = vmov 0.0|0.0  }
 0x707   :  { %2617 = vmatprep.subr.bf16.mxu0 %v3185_v13  ;;  %2649 = vmatprep.subr.bf16.mxu1 %v3335_v62  ;;  %v2102_v13 = vsel %vm1916_vm8, 1.0, %v3023_v31 }
 0x708   :  { %1810 = vmatprep.mubr.f32.mxu0 %v3023_v31  ;;  %1881 = vmatprep.mubr.f32.mxu1 %v3023_v31 }
 0x709   :  { %1921 = vperm.xlu1 %2770, %v2102_v13   ;;  %v1027_v13 = vpop.permute.xlu1 %1026 }
 0x70a   :  { %2619 = vmatpush1.bf16.msra.mxu0 %v3188_v16  ;;  %2651 = vmatpush1.bf16.msra.mxu1 %v3338_v3 }
 0x70b   :  { %2621 = vmatprep.subr.bf16.mxu0 %v3192_v19  ;;  %2653 = vmatprep.subr.bf16.mxu1 %v3342_v4 }
 0x70e   :  { %2623 = vmatpush1.bf16.msra.mxu0 %v3194_v22  ;;  %2655 = vmatpush1.bf16.msra.mxu1 %v3345_v17 }
 0x70f   :  { %2625 = vmatprep.subr.bf16.mxu0 %v3206_v26  ;;  %2657 = vmatprep.subr.bf16.mxu1 %v3348_v18 }
 0x712   :  { %2627 = vmatpush1.bf16.msra.mxu0 %v3208_v29  ;;  %2659 = vmatpush1.bf16.msra.mxu1 %v3351_v30 }
 0x713   :  { %2629 = vmatprep.subr.bf16.mxu0 %v3220_v34  ;;  %2661 = vmatprep.subr.bf16.mxu1 %v3354_v32 }
 0x716   :  { %2631 = vmatpush1.bf16.msra.mxu0 %v3222_v37  ;;  %2663 = vmatpush1.bf16.msra.mxu1 %v3357_v40 }
 0x717   :  { %2633 = vmatprep.subr.bf16.mxu0 %v3234_v41  ;;  %2665 = vmatprep.subr.bf16.mxu1 %v3360_v42  ;;  %v155_v42 = vld [vmem:[#allocation8] sm:$0xff] }
 0x71a   :  { %2635 = vmatpush1.bf16.msra.mxu0 %v3236_v44  ;;  %2667 = vmatpush1.bf16.msra.mxu1 %v3363_v48  ;;  %v156_v48 = vld [vmem:[#allocation8 + $0x8] sm:$0xff] }
 0x71b   :  { %2637 = vmatprep.subr.bf16.mxu0 %v3251_v56  ;;  %2669 = vmatprep.subr.bf16.mxu1 %v3366_v49 }
 0x71e   :  { %2639 = vmatpush1.bf16.msra.mxu0 %v3253_v60  ;;  %2671 = vmatpush1.bf16.msra.mxu1 %v3369_v55 }
 0x71f   :  { %2641 = vmatprep.subr.bf16.mxu0 %v3261_v5  ;;  %2673 = vmatprep.subr.bf16.mxu1 %v3372_v57  ;;  %v2677_v57 = vpack.c.bf16 %v156_v48, %v155_v42 }
 0x722   :  { %2643 = vmatpush1.bf16.msra.mxu0 %v3264_v12  ;;  %2675 = vmatpush1.bf16.msra.mxu1 %v3375_v1 }
 0x723   :  { %2676 = vmatprep.subr.bf16.mxu0 %v3025_v9 }
 0x7d8   :  { %v1633_v16 = vpop.f32.mrb[12].mxu0  ;;  %v1704_v19 = vpop.f32.mrb[12].mxu1 }
 0x7d9   :  { %v2712_v22 = vadd.f32 %v1633_v16, %v3405_v11  ;;  %v1635_v26 = vpop.f32.mrb[13].mxu0  ;;  %v1706_v29 = vpop.f32.mrb[13].mxu1  ;;  %v2726_v60 = vadd.f32 %v1704_v19, %v3413_v21  ;;  %v1029_v16 = vmul.f32 %v1027_v13, %v3473_v33 }
 0x7da   :  { %v2713_v34 = vadd.f32 %v1635_v26, %v3407_v15  ;;  %v2727_v44 = vadd.f32 %v1706_v29, %v3417_v47  ;;  %v1206_v19 = vpop.permute.xlu1 %1205 }
 0x7db   :  { %v2095_v37 = vmul.f32 -1.442695, %v2712_v22  ;;  %v1208_v22 = vmul.f32 %v1206_v19, %v3521_v39 }
 0x7dc   :  { %v2096_v41 = vmul.f32 -1.442695, %v2713_v34  ;;  %v2097_v56 = vmul.f32 -1.442695, %v2727_v44 }
 0x7dd   :  { %2865 = vpow2.f32 %v2095_v37 }
 0x7de   :  { %2867 = vpow2.f32 %v2096_v41  ;;  %v1385_v26 = vpop.permute.xlu1 %1384 }
 0x7df   :  { %2869 = vpow2.f32 %v2097_v56  ;;  %v1387_v27 = vmul.f32 %v1385_v26, %v3569_v50 }
 0x7e0   :  { %2871 = vtanh.f32 %v2726_v60 }
 0x7e7   :  { %v2866_v5 = vpop.eup %2865 }
 0x7e8   :  { %v2868_v12 = vpop.eup %2867  ;;  %v1716_v10 = vadd.f32 1.0, %v2866_v5 }
 0x7e9   :  { %v1722_v59 = vadd.f32 1.0, %v2868_v12  ;;  %v2870_v62 = vpop.eup %2869 }
 0x7ea   :  { %2873 = vrcp.f32 %v1716_v10  ;;  %v2872_v3 = vpop.eup %2871  ;;  %v1729_v30 = vadd.f32 1.0, %v2870_v62 }
 0x7eb   :  { %2875 = vrcp.f32 %v1722_v59 }
 0x7ec   :  { %2877 = vrcp.f32 %v1729_v30 }
 0x7f4   :  { %v2874_v4 = vpop.eup %2873 }
 0x7f5   :  { %v2876_v17 = vpop.eup %2875  ;;  %v1733_v18 = vmul.f32 %v2874_v4, %v2872_v3 }
 0x7f6   :  { %v1732_v32 = vmul.f32 %v2876_v17, %v3614_v7  ;;  %v2878_v49 = vpop.eup %2877  ;;  %v2698_v7 = vpack.c.bf16 %v170_v46, %v169_v45 }
 0x7f8   :  { %v3661_v40 = vadd.f32 %v1733_v18, %v1732_v32 }
 0x7fa   :  { %2879 = vtanh.f32 %v3661_v40 }
 0x804   :  { %v2880_v55 = vpop.eup %2879 }
 0x805   :  { %v1736_v1 = vmul.f32 %v2880_v55, %v2878_v49 }
 0x807   :  { %1811 = vmatmul.mubr.f32.vlgmr.msra.gmra.mrb[14].mxu0 %v1736_v1  ;;  %1882 = vmatmul.mubr.f32.vlgmr.msra.gmra.mrb[14].mxu1 %v1736_v1 }
 0x808   :  { %2678 = vmatpush3.bf16.msra.mxu0 %v2677_v57  ;;  %2159 = vmatprep.mubr.msk.f32.mxu0 %vm3026_vm9, %v3023_v31 }
 0x809   :  { %2679 = vmatprep.subr.bf16.mxu0 %v3025_v9 }
 0x80c   :  { %2681 = vmatpush3.bf16.msra.mxu0 %v2680_v63 }
 0x80d   :  { %2682 = vmatprep.subr.bf16.mxu0 %v3025_v9 }
 0x810   :  { %2684 = vmatpush3.bf16.msra.mxu0 %v2683_v0 }
 0x811   :  { %2685 = vmatprep.subr.bf16.mxu0 %v3025_v9 }
 0x814   :  { %2687 = vmatpush3.bf16.msra.mxu0 %v2686_v2 }
 0x815   :  { %2688 = vmatprep.subr.bf16.mxu0 %v3025_v9 }
 0x818   :  { %2690 = vmatpush3.bf16.msra.mxu0 %v2689_v8 }
 0x819   :  { %2691 = vmatprep.subr.bf16.mxu0 %v3025_v9 }
 0x81c   :  { %2693 = vmatpush3.bf16.msra.mxu0 %v2692_v28 }
 0x81d   :  { %2694 = vmatprep.subr.bf16.mxu0 %v3025_v9 }
 0x820   :  { %2696 = vmatpush3.bf16.msra.mxu0 %v2695_v24 }
 0x821   :  { %2697 = vmatprep.subr.bf16.mxu0 %v3025_v9  ;;  %v1564_v9 = vpop.permute.xlu1 %1563 }
 0x822   :  { %v1566_v33 = vmul.f32 %v1564_v9, %v3617_v54 }
 0x824   :  { %2699 = vmatpush3.bf16.msra.mxu0 %v2698_v7 }
 0x825   :  { %v1743_v29 = vpop.permute.xlu1 %1742 }
 0x826   :  { %v1745_v39 = vmul.f32 %v1743_v29, %v1736_v1 }
 0x827   :  { %2160 = vmatmul.mubr.f32.vlgmr.msra.gmra.mrb[16].mxu0 %v850_v53 }
 0x828   :  { %2162 = vmatprep.mubr.msk.f32.mxu0 %vm3026_vm9, %v3023_v31 }
 0x829   :  { %v1922_v2 = vpop.permute.xlu1 %1921 }
 0x82b   :  { %2163 = vmatmul.mubr.f32.gmra.mrb[18].mxu0 %v1029_v16 }
 0x82c   :  { %2165 = vmatprep.mubr.msk.f32.mxu0 %vm3026_vm9, %v3023_v31 }
 0x82f   :  { %2166 = vmatmul.mubr.f32.gmra.mrb[20].mxu0 %v1208_v22 }
 0x830   :  { %2168 = vmatprep.mubr.msk.f32.mxu0 %vm3026_vm9, %v3023_v31 }
 0x833   :  { %2169 = vmatmul.mubr.f32.gmra.mrb[22].mxu0 %v1387_v27 }
 0x834   :  { %2171 = vmatprep.mubr.msk.f32.mxu0 %vm3026_vm9, %v3023_v31 }
 0x837   :  { %2172 = vmatmul.mubr.f32.gmra.mrb[24].mxu0 %v1566_v33 }
 0x838   :  { %2174 = vmatprep.mubr.msk.f32.mxu0 %vm3026_vm9, %v3023_v31 }
 0x83b   :  { %2175 = vmatmul.mubr.f32.gmra.mrb[26].mxu0 %v1745_v39 }
 0x83c   :  { %2177 = vmatprep.mubr.msk.f32.mxu0 %vm3026_vm9, %v3023_v31 }
 0x8da   :  { %v1812_v34 = vpop.f32.mrb[14].mxu0  ;;  %v1883_v37 = vpop.f32.mrb[14].mxu1 }
 0x8db   :  { %v2714_v50 = vadd.f32 %v1812_v34, %v3405_v11  ;;  %v1814_v41 = vpop.f32.mrb[15].mxu0  ;;  %v1885_v44 = vpop.f32.mrb[15].mxu1  ;;  %v2728_v10 = vadd.f32 %v1883_v37, %v3413_v21  ;;  %v2103_v21 = vld [vmem:[%s3722_s9] ss:$0 sm:$0xff]  ;;  %s3027_s9 = smov [#allocation10]  }
 0x8dc   :  { %v2715_v56 = vadd.f32 %v1814_v41, %v3407_v15  ;;  %v2729_v5 = vadd.f32 %v1885_v44, %v3417_v47  ;;  %s2043_s21 = sshll.u32 %s3027_s9, 4  ;;  %s2044_s21 = int_to_ptr.vmem [resolvable:$true] %s2043_s21 }
 0x8dd   :  { %v2099_v60 = vmul.f32 -1.442695, %v2714_v50  ;;  %s2985_s26 = scalar_lea.vmem %s2044_s21, 896  ;;  %p2990_p5 = scmp.lt.s32.totalorder %s2044_s21, %s2044_s21 }
 0x8de   :  { %v2100_v54 = vmul.f32 -1.442695, %v2715_v56  ;;  %v2101_v12 = vmul.f32 -1.442695, %v2729_v5  ;;  %p2986_p4 = scmp.ne.s32.totalorder %s2044_s21, %s2985_s26  ;;  %p2991_p6 = scmp.lt.s32.totalorder %s2985_s26, %s2985_s26 }
 0x8df   :  { %2881 = vpow2.f32 %v2099_v60 }
 0x8e0   :  { %2883 = vpow2.f32 %v2100_v54  ;;  %p2992_p7 = por %p2991_p6, %p2990_p5 }
 0x8e1   :  { %2885 = vpow2.f32 %v2101_v12 }
 0x8e2   :  { %2887 = vtanh.f32 %v2728_v10  ;;  %p2993_p8 = pnand %p2992_p7, %p2986_p4 }
 0x8e9   :  { %v2882_v59 = vpop.eup %2881 }
 0x8ea   :  { %v2884_v62 = vpop.eup %2883  ;;  %v1895_v31 = vadd.f32 1.0, %v2882_v59 }
 0x8eb   :  { %v1901_v3 = vadd.f32 1.0, %v2884_v62  ;;  %v2886_v11 = vpop.eup %2885 }
 0x8ec   :  { %2889 = vrcp.f32 %v1895_v31  ;;  %v2888_v4 = vpop.eup %2887  ;;  %v1908_v30 = vadd.f32 1.0, %v2886_v11 }
 0x8ed   :  { %2891 = vrcp.f32 %v1901_v3 }
 0x8ee   :  { %2893 = vrcp.f32 %v1908_v30 }
 0x8f6   :  { %v2890_v15 = vpop.eup %2889 }
 0x8f7   :  { %v2892_v17 = vpop.eup %2891  ;;  %v1912_v18 = vmul.f32 %v2890_v15, %v2888_v4 }
 0x8f8   :  { %v1911_v32 = vmul.f32 %v2892_v17, %v3661_v40  ;;  %v2894_v61 = vpop.eup %2893 }
 0x8fa   :  { %v1913_v47 = vadd.f32 %v1912_v18, %v1911_v32  ;;  %v1997_v42 = vpop.f32.mrb[16].mxu0 }
 0x8fb   :  { %v1998_v48 = vadd.f32 %v2103_v21, %v1997_v42  ;;  %v2161_v49 = vpop.f32.mrb[17].mxu0 }
 0x8fc   :  { %2895 = vtanh.f32 %v1913_v47 }
 0x8fd   :  { %2031 = vst [vmem:[#allocation10] sm:$0xff] %v1998_v48 }
 0x8fe   :  { %v2002_v55 = vpop.f32.mrb[18].mxu0 }
 0x8ff   :  { %v2003_v57 = vadd.f32 %v2103_v21, %v2002_v55  ;;  %v2164_v1 = vpop.f32.mrb[19].mxu0 }
 0x901   :  { %2032 = vst [vmem:[#allocation10 + $0x8] sm:$0xff] %v2003_v57 }
 0x902   :  { %v2007_v43 = vpop.f32.mrb[20].mxu0 }
 0x903   :  { %v2008_v58 = vadd.f32 %v2103_v21, %v2007_v43  ;;  %v2167_v63 = vpop.f32.mrb[21].mxu0 }
 0x905   :  { %2033 = vst [vmem:[#allocation10 + $0x10] sm:$0xff] %v2008_v58 }
 0x906   :  { %v2896_v40 = vpop.eup %2895  ;;  %v2012_v38 = vpop.f32.mrb[22].mxu0 }
 0x907   :  { %v1915_v0 = vmul.f32 %v2896_v40, %v2894_v61  ;;  %v2013_v6 = vadd.f32 %v2103_v21, %v2012_v38  ;;  %v2170_v14 = vpop.f32.mrb[23].mxu0 }
 0x909   :  { %v1924_v20 = vmul.f32 %v1922_v2, %v1915_v0  ;;  %2034 = vst [vmem:[#allocation10 + $0x18] sm:$0xff] %v2013_v6 }
 0x90a   :  { %v2017_v25 = vpop.f32.mrb[24].mxu0 }
 0x90b   :  { %v2018_v8 = vadd.f32 %v2103_v21, %v2017_v25  ;;  %v2173_v23 = vpop.f32.mrb[25].mxu0  ;;  %2178 = vmatmul.mubr.f32.gmra.mrb[28].mxu0 %v1924_v20 }
 0x90d   :  { %2035 = vst [vmem:[#allocation10 + $0x20] sm:$0xff] %v2018_v8 }
 0x90e   :  { %v2022_v51 = vpop.f32.mrb[26].mxu0 }
 0x90f   :  { %v2023_v28 = vadd.f32 %v2103_v21, %v2022_v51  ;;  %v2176_v35 = vpop.f32.mrb[27].mxu0 }
 0x911   :  { %2036 = vst [vmem:[#allocation10 + $0x28] sm:$0xff] %v2023_v28 }
 0x9de   :  { %v2027_v36 = vpop.f32.mrb[28].mxu0 }
 0x9df   :  { %v2028_v24 = vadd.f32 %v2103_v21, %v2027_v36  ;;  %v2179_v45 = vpop.f32.mrb[29].mxu0 }
 0x9e1   :  { %2037 = vst [vmem:[#allocation10 + $0x30] sm:$0xff] %v2028_v24 }
 0x9e2   :  { %2996 = shalt.err (!%p2993_p8)
}
 0x9e3   :  { %s2997_s24 = scalar_lea.hbm %s3723_s10, 896 }
 0x9e4   :  { %p2998_p9 = scmp.ne.s32.totalorder %s3723_s10, %s2997_s24  ;;  %p3001_p10 = scmp.lt.u32.totalorder %s2997_s24, %s3723_s10 }
 0x9e6   :  { %p3003_p11 = pnand %p3001_p10, %p2998_p9 }
 0x9e8   :  { %3006 = shalt.err (!%p3003_p11)
}
 0x9e9   :  { %2049 = dma.vmem_to_hbm [thread:$0]  %s2044_s21, 896, %s3723_s10, [#allocation4], %s3021_s6, %s3021_s6, %s3022_s25  }
 0x9ea   :  { %3013 = dma.done.wait [#allocation4], 896  }
 0x9eb   :  { %3014 = vsyncadd [#allocation4], 4294966400 }
 0x9ec   :  { %2053 = vsyncpa [#allocation3], 1 }
 0x9ed   :  { %2054 = vsyncpa [#allocation6], 1 }
 0x9ee   :  { %2055 = vsyncpa [#allocation9], 1 }
 0x9ef   :  { %2056 = vsyncpa [#allocation4], 1 }

</bundles_post_ra>
